<compile_context>
chip_gen: v7x
topology: tpu7x:2x2x1
jax: 0.10.0
libtpu: 0.0.40
codegen_flags: <defaults>
</compile_context>

<pallas_src>
import numpy as np
import jax
import jax.numpy as jnp
from jax import lax
from jax.experimental import pallas as pl
from jax.experimental.pallas import tpu as pltpu

NEG_SLOPE = 0.01  # nn.LeakyReLU default negative_slope


def _leaky(x):
    # valid for 0 < slope < 1: max(x, slope*x) == leaky_relu(x)
    return jnp.maximum(x, NEG_SLOPE * x)


# ----------------------------- fused Pallas kernel -----------------------------

def _cnn2_fused_kernel(x_ref, a1_ref, b1_ref, a2_ref, b2_ref,
                       a3_ref, b3_ref, w1_ref, bf1_ref, w2_ref, bf2_ref,
                       out_ref):
    f32 = jnp.float32
    x = x_ref[0]                                   # (28, 28*Cin)

    def conv_rows(inp, a_ref, k, oh):
        # sum over kernel rows of a shifted-row matmul; a_ref[kh] is the
        # block-structured (W_in*Cin, OW*Cout) weight matrix for kernel row kh.
        acc = jnp.dot(inp[0:oh, :], a_ref[0], preferred_element_type=f32)
        for kh in range(1, k):
            acc = acc + jnp.dot(inp[kh:kh + oh, :], a_ref[kh],
                                preferred_element_type=f32)
        return acc

    def pool2x2(y, ph):
        # y: (2*ph, 2*pw*C) whose columns are pre-permuted to [even-ow | odd-ow]
        half = y.shape[1] // 2
        cm = jnp.maximum(y[:, :half], y[:, half:])            # horizontal 2-max
        oh = y.shape[0]
        r = lax.broadcasted_iota(jnp.int32, (ph, oh), 0)
        c = lax.broadcasted_iota(jnp.int32, (ph, oh), 1)
        sel_e = (c == 2 * r).astype(f32)                      # picks rows 0,2,4,...
        sel_o = (c == 2 * r + 1).astype(f32)                  # picks rows 1,3,5,...
        return jnp.maximum(jnp.dot(sel_e, cm, preferred_element_type=f32),
                           jnp.dot(sel_o, cm, preferred_element_type=f32))

    # block 1: Conv2d(Cin,6,5) -> MaxPool2d(2,2) -> LeakyReLU  (Dropout = identity)
    y1 = conv_rows(x, a1_ref, 5, 24)                          # (24, 24*6)
    h1 = _leaky(pool2x2(y1, 12) + b1_ref[...])                # (12, 12*6)

    # block 2: Conv2d(6,9,5) -> MaxPool2d(2,2) -> LeakyReLU    (Dropout = identity)
    y2 = conv_rows(h1, a2_ref, 5, 8)                          # (8, 8*9)
    h2 = _leaky(pool2x2(y2, 4) + b2_ref[...])                 # (4, 4*9)

    # block 3: Conv2d(9,6,2) -> LeakyReLU
    h3 = _leaky(conv_rows(h2, a3_ref, 2, 3) + b3_ref[...])    # (3, 3*6)

    # fc1(54->20) -> LeakyReLU -> fc2(20->10); the torch-NCHW flatten permutation
    # is folded into the packing of w1_ref, so no transpose/flatten is needed here.
    z = bf1_ref[...]                                          # (1, 20)
    for r in range(3):
        z = z + jnp.dot(h3[r:r + 1, :], w1_ref[r], preferred_element_type=f32)
    z = _leaky(z)
    out_ref[0] = jnp.dot(z, w2_ref[...], preferred_element_type=f32) + bf2_ref[...]


# ------------------------- one-time host-side weight repack -------------------------

def pack_params(params):
    """Repack torch-layout params into the matrices used by the fused kernel:
    per-kernel-row conv matrices (with pooled-column permutation folded in) and
    fc1 with the NCHW flatten permutation folded in."""

    def conv_row_mats(w_oihw, w_in, pool):
        w = np.asarray(w_oihw, np.float32)               # (cout, cin, k, k)
        cout, cin, k, _ = w.shape
        ow = w_in - k + 1
        a = np.zeros((k, w_in * cin, ow * cout), np.float32)
        for kh in range(k):
            for kw in range(k):
                wt = w[:, :, kh, kw].T                   # (cin, cout)
                for o in range(ow):
                    iw = o + kw
                    a[kh, iw * cin:(iw + 1) * cin, o * cout:(o + 1) * cout] += wt
        if pool:
            assert ow % 2 == 0, "2x2 maxpool needs an even conv output width"
            perm = np.concatenate([np.arange(0, ow, 2), np.arange(1, ow, 2)])
            a = (a.reshape(k, w_in * cin, ow, cout)[:, :, perm, :]
                   .reshape(k, w_in * cin, ow * cout))
        return jnp.asarray(a)

    def bias_row(b, n_blocks):
        return jnp.asarray(np.tile(np.asarray(b, np.float32), n_blocks)[None, :])

    # geometry: 28 -conv5-> 24 -pool-> 12 -conv5-> 8 -pool-> 4 -conv2-> 3
    packed = {
        'A1': conv_row_mats(params['conv1_w'], 28, True),
        'b1': bias_row(params['conv1_b'], 12),
        'A2': conv_row_mats(params['conv2_w'], 12, True),
        'b2': bias_row(params['conv2_b'], 4),
        'A3': conv_row_mats(params['conv3_w'], 4, False),
        'b3': bias_row(params['conv3_b'], 3),
    }
    # fc1: torch flattens conv3 output (B, 6, 3, 3) as c*9 + r*3 + col; the kernel's
    # conv3 activation is laid out as h3[r, col*6 + c].
    fc1 = np.asarray(params['fc1_w'], np.float32)        # (20, 54)
    w1 = np.zeros((3, 18, 20), np.float32)
    for r in range(3):
        for col in range(3):
            for c in range(6):
                w1[r, col * 6 + c, :] = fc1[:, c * 9 + r * 3 + col]
    packed['W1'] = jnp.asarray(w1)
    packed['bf1'] = jnp.asarray(np.asarray(params['fc1_b'], np.float32)[None, :])
    packed['W2'] = jnp.asarray(np.asarray(params['fc2_w'], np.float32).T)   # (20, 10)
    packed['bf2'] = jnp.asarray(np.asarray(params['fc2_b'], np.float32)[None, :])
    return packed


# ----------------------------------- forward -----------------------------------

def cnn2_forward(x_nchw, packed):
    x = jnp.transpose(x_nchw, (0, 2, 3, 1)).astype(jnp.float32)   # NCHW -> NHWC
    b, h, w, c = x.shape
    assert (h, w) == (28, 28), "CNN2 geometry implies 28x28 inputs"
    x2d = x.reshape(b, h, w * c)                                  # (B, H, W*C)

    weight_args = (packed['A1'], packed['b1'], packed['A2'], packed['b2'],
                   packed['A3'], packed['b3'], packed['W1'], packed['bf1'],
                   packed['W2'], packed['bf2'])
    in_specs = [pl.BlockSpec((1, h, w * c), lambda i: (i, 0, 0))]
    in_specs += [pl.BlockSpec(a.shape, lambda i, nd=a.ndim: (0,) * nd)
                 for a in weight_args]                            # resident weights

    out = pl.pallas_call(
        _cnn2_fused_kernel,
        out_shape=jax.ShapeDtypeStruct((b, 1, 10), jnp.float32),
        grid=(b,),
        in_specs=in_specs,
        out_specs=pl.BlockSpec((1, 1, 10), lambda i: (i, 0, 0)),
        compiler_params=pltpu.CompilerParams(
            dimension_semantics=("parallel",)),   # shard batch across TCs on v7x
    )(x2d, *weight_args)
    return out.reshape(b, 10)


# ---------------------------- pure-JAX reference ----------------------------

def cnn2_reference(x_nchw, params):
    dn = ('NCHW', 'OIHW', 'NCHW')

    def conv(x, w, bias):
        y = lax.conv_general_dilated(x, w, (1, 1), 'VALID', dimension_numbers=dn,
                                     precision=lax.Precision.HIGHEST)
        return y + bias[None, :, None, None]

    def pool(x):
        n, c, h, w = x.shape
        return x.reshape(n, c, h // 2, 2, w // 2, 2).max(axis=(3, 5))

    x = x_nchw.astype(jnp.float32)
    x = _leaky(pool(conv(x, params['conv1_w'], params['conv1_b'])))
    x = _leaky(pool(conv(x, params['conv2_w'], params['conv2_b'])))
    x = _leaky(conv(x, params['conv3_w'], params['conv3_b']))
    x = x.reshape(x.shape[0], -1)
    x = _leaky(jnp.dot(x, params['fc1_w'].T, precision='highest') + params['fc1_b'])
    return jnp.dot(x, params['fc2_w'].T, precision='highest') + params['fc2_b']


# ---------------------------------- main ----------------------------------

if __name__ == "__main__":
    channels_in, batch = 3, 2
    key = jax.random.PRNGKey(0)
    kx, k1, k2, k3, k4, k5 = jax.random.split(key, 6)

    def u(k, shape):  # deterministic small uniform init (synthetic; bias=0.01 as in module)
        return jax.random.uniform(k, shape, jnp.float32, minval=-0.1, maxval=0.1)

    params = {
        'conv1_w': u(k1, (6, channels_in, 5, 5)), 'conv1_b': jnp.full((6,), 0.01, jnp.float32),
        'conv2_w': u(k2, (9, 6, 5, 5)),           'conv2_b': jnp.full((9,), 0.01, jnp.float32),
        'conv3_w': u(k3, (6, 9, 2, 2)),           'conv3_b': jnp.full((6,), 0.01, jnp.float32),
        'fc1_w':   u(k4, (20, 54)),               'fc1_b':   jnp.full((20,), 0.01, jnp.float32),
        'fc2_w':   u(k5, (10, 20)),               'fc2_b':   jnp.full((10,), 0.01, jnp.float32),
    }

    # CNN2's geometry implies 28x28 inputs (-> 3*3*6 = 54 features before fc).
    x = jax.random.normal(kx, (batch, channels_in, 28, 28), jnp.float32)

    packed = pack_params(params)          # one-time host-side weight repack
    out = jax.jit(cnn2_forward)(x, packed)
    out = jax.block_until_ready(out)
    assert out.shape == (batch, 10)

    ref = cnn2_reference(x, params)
    np.testing.assert_allclose(np.asarray(out), np.asarray(ref), rtol=2e-2, atol=1e-3)

    print("KERNEL_OK")
</pallas_src>

<mosaic_0001>
module attributes {stable_mosaic.version = 11 : i64} {
  func.func @_cnn2_fused_kernel(%arg0: i32, %arg1: memref<1x28x84xf32, #tpu.memory_space<vmem>>, %arg2: memref<5x84x144xf32, #tpu.memory_space<vmem>>, %arg3: memref<1x72xf32, #tpu.memory_space<vmem>>, %arg4: memref<5x72x72xf32, #tpu.memory_space<vmem>>, %arg5: memref<1x36xf32, #tpu.memory_space<vmem>>, %arg6: memref<2x36x18xf32, #tpu.memory_space<vmem>>, %arg7: memref<1x18xf32, #tpu.memory_space<vmem>>, %arg8: memref<3x18x20xf32, #tpu.memory_space<vmem>>, %arg9: memref<1x20xf32, #tpu.memory_space<vmem>>, %arg10: memref<20x10xf32, #tpu.memory_space<vmem>>, %arg11: memref<1x10xf32, #tpu.memory_space<vmem>>, %arg12: memref<1x1x10xf32, #tpu.memory_space<vmem>>) attributes {dimension_semantics = [#tpu.dimension_semantics<parallel>], iteration_bounds = array<i64: 2>, scalar_prefetch = 0 : i64, scratch_operands = 0 : i64, tpu.core_type = #tpu.core_type<tc>, window_params = [{transform_indices = @transform_0, window_bounds = array<i64: 1, 28, 84>}, {pipeline_mode = #tpu.pipeline_mode<synchronous>, transform_indices = @transform_1, window_bounds = array<i64: 5, 84, 144>}, {pipeline_mode = #tpu.pipeline_mode<synchronous>, transform_indices = @transform_2, window_bounds = array<i64: 1, 72>}, {pipeline_mode = #tpu.pipeline_mode<synchronous>, transform_indices = @transform_3, window_bounds = array<i64: 5, 72, 72>}, {pipeline_mode = #tpu.pipeline_mode<synchronous>, transform_indices = @transform_4, window_bounds = array<i64: 1, 36>}, {pipeline_mode = #tpu.pipeline_mode<synchronous>, transform_indices = @transform_5, window_bounds = array<i64: 2, 36, 18>}, {pipeline_mode = #tpu.pipeline_mode<synchronous>, transform_indices = @transform_6, window_bounds = array<i64: 1, 18>}, {pipeline_mode = #tpu.pipeline_mode<synchronous>, transform_indices = @transform_7, window_bounds = array<i64: 3, 18, 20>}, {pipeline_mode = #tpu.pipeline_mode<synchronous>, transform_indices = @transform_8, window_bounds = array<i64: 1, 20>}, {pipeline_mode = #tpu.pipeline_mode<synchronous>, transform_indices = @transform_9, window_bounds = array<i64: 20, 10>}, {pipeline_mode = #tpu.pipeline_mode<synchronous>, transform_indices = @transform_10, window_bounds = array<i64: 1, 10>}, {transform_indices = @transform_11, window_bounds = array<i64: 1, 1, 10>}]} {
    %c0 = arith.constant 0 : index
    %c0_0 = arith.constant 0 : index
    %c0_1 = arith.constant 0 : index
    %0 = vector.load %arg1[%c0, %c0_0, %c0_1] : memref<1x28x84xf32, #tpu.memory_space<vmem>>, vector<1x28x84xf32>
    %1 = vector.shape_cast %0 : vector<1x28x84xf32> to vector<28x84xf32>
    %2 = vector.extract_strided_slice %1 {offsets = [0, 0], sizes = [24, 84], strides = [1, 1]} : vector<28x84xf32> to vector<24x84xf32>
    %c0_2 = arith.constant 0 : index
    %c0_3 = arith.constant 0 : index
    %c0_4 = arith.constant 0 : index
    %3 = vector.load %arg2[%c0_2, %c0_3, %c0_4] : memref<5x84x144xf32, #tpu.memory_space<vmem>>, vector<1x84x144xf32>
    %4 = vector.shape_cast %3 : vector<1x84x144xf32> to vector<84x144xf32>
    %cst = arith.constant dense<0.000000e+00> : vector<24x144xf32>
    %5 = tpu.matmul %2, %4, %cst {dimension_numbers = #tpu.dot_dimension_numbers<[1], [0], [0], [1], [0, 0, 1, 1], [], []>} : vector<24x84xf32>, vector<84x144xf32>, vector<24x144xf32> -> vector<24x144xf32>
    %6 = vector.extract_strided_slice %1 {offsets = [1, 0], sizes = [24, 84], strides = [1, 1]} : vector<28x84xf32> to vector<24x84xf32>
    %c1 = arith.constant 1 : index
    %c0_5 = arith.constant 0 : index
    %c0_6 = arith.constant 0 : index
    %7 = vector.load %arg2[%c1, %c0_5, %c0_6] : memref<5x84x144xf32, #tpu.memory_space<vmem>>, vector<1x84x144xf32>
    %8 = vector.shape_cast %7 : vector<1x84x144xf32> to vector<84x144xf32>
    %cst_7 = arith.constant dense<0.000000e+00> : vector<24x144xf32>
    %9 = tpu.matmul %6, %8, %cst_7 {dimension_numbers = #tpu.dot_dimension_numbers<[1], [0], [0], [1], [0, 0, 1, 1], [], []>} : vector<24x84xf32>, vector<84x144xf32>, vector<24x144xf32> -> vector<24x144xf32>
    %10 = arith.addf %5, %9 : vector<24x144xf32>
    %11 = vector.extract_strided_slice %1 {offsets = [2, 0], sizes = [24, 84], strides = [1, 1]} : vector<28x84xf32> to vector<24x84xf32>
    %c2 = arith.constant 2 : index
    %c0_8 = arith.constant 0 : index
    %c0_9 = arith.constant 0 : index
    %12 = vector.load %arg2[%c2, %c0_8, %c0_9] : memref<5x84x144xf32, #tpu.memory_space<vmem>>, vector<1x84x144xf32>
    %13 = vector.shape_cast %12 : vector<1x84x144xf32> to vector<84x144xf32>
    %cst_10 = arith.constant dense<0.000000e+00> : vector<24x144xf32>
    %14 = tpu.matmul %11, %13, %cst_10 {dimension_numbers = #tpu.dot_dimension_numbers<[1], [0], [0], [1], [0, 0, 1, 1], [], []>} : vector<24x84xf32>, vector<84x144xf32>, vector<24x144xf32> -> vector<24x144xf32>
    %15 = arith.addf %10, %14 : vector<24x144xf32>
    %16 = vector.extract_strided_slice %1 {offsets = [3, 0], sizes = [24, 84], strides = [1, 1]} : vector<28x84xf32> to vector<24x84xf32>
    %c3 = arith.constant 3 : index
    %c0_11 = arith.constant 0 : index
    %c0_12 = arith.constant 0 : index
    %17 = vector.load %arg2[%c3, %c0_11, %c0_12] : memref<5x84x144xf32, #tpu.memory_space<vmem>>, vector<1x84x144xf32>
    %18 = vector.shape_cast %17 : vector<1x84x144xf32> to vector<84x144xf32>
    %cst_13 = arith.constant dense<0.000000e+00> : vector<24x144xf32>
    %19 = tpu.matmul %16, %18, %cst_13 {dimension_numbers = #tpu.dot_dimension_numbers<[1], [0], [0], [1], [0, 0, 1, 1], [], []>} : vector<24x84xf32>, vector<84x144xf32>, vector<24x144xf32> -> vector<24x144xf32>
    %20 = arith.addf %15, %19 : vector<24x144xf32>
    %21 = vector.extract_strided_slice %1 {offsets = [4, 0], sizes = [24, 84], strides = [1, 1]} : vector<28x84xf32> to vector<24x84xf32>
    %c4 = arith.constant 4 : index
    %c0_14 = arith.constant 0 : index
    %c0_15 = arith.constant 0 : index
    %22 = vector.load %arg2[%c4, %c0_14, %c0_15] : memref<5x84x144xf32, #tpu.memory_space<vmem>>, vector<1x84x144xf32>
    %23 = vector.shape_cast %22 : vector<1x84x144xf32> to vector<84x144xf32>
    %cst_16 = arith.constant dense<0.000000e+00> : vector<24x144xf32>
    %24 = tpu.matmul %21, %23, %cst_16 {dimension_numbers = #tpu.dot_dimension_numbers<[1], [0], [0], [1], [0, 0, 1, 1], [], []>} : vector<24x84xf32>, vector<84x144xf32>, vector<24x144xf32> -> vector<24x144xf32>
    %25 = arith.addf %20, %24 : vector<24x144xf32>
    %26 = vector.extract_strided_slice %25 {offsets = [0, 0], sizes = [24, 72], strides = [1, 1]} : vector<24x144xf32> to vector<24x72xf32>
    %27 = vector.extract_strided_slice %25 {offsets = [0, 72], sizes = [24, 72], strides = [1, 1]} : vector<24x144xf32> to vector<24x72xf32>
    %28 = arith.maximumf %26, %27 : vector<24x72xf32>
    %29 = tpu.iota {dimensions = array<i32: 0>} : vector<12x24xi32>
    %30 = tpu.iota {dimensions = array<i32: 1>} : vector<12x24xi32>
    %c2_i32 = arith.constant 2 : i32
    %31 = vector.broadcast %c2_i32 : i32 to vector<12x24xi32>
    %32 = arith.muli %31, %29 : vector<12x24xi32>
    %33 = arith.cmpi eq, %30, %32 : vector<12x24xi32>
    %34 = arith.extui %33 : vector<12x24xi1> to vector<12x24xi32>
    %35 = arith.sitofp %34 : vector<12x24xi32> to vector<12x24xf32>
    %c2_i32_17 = arith.constant 2 : i32
    %36 = vector.broadcast %c2_i32_17 : i32 to vector<12x24xi32>
    %37 = arith.muli %36, %29 : vector<12x24xi32>
    %c1_i32 = arith.constant 1 : i32
    %38 = vector.broadcast %c1_i32 : i32 to vector<12x24xi32>
    %39 = arith.addi %37, %38 : vector<12x24xi32>
    %40 = arith.cmpi eq, %30, %39 : vector<12x24xi32>
    %41 = arith.extui %40 : vector<12x24xi1> to vector<12x24xi32>
    %42 = arith.sitofp %41 : vector<12x24xi32> to vector<12x24xf32>
    %cst_18 = arith.constant dense<0.000000e+00> : vector<12x72xf32>
    %43 = tpu.matmul %35, %28, %cst_18 {dimension_numbers = #tpu.dot_dimension_numbers<[1], [0], [0], [1], [0, 0, 1, 1], [], []>} : vector<12x24xf32>, vector<24x72xf32>, vector<12x72xf32> -> vector<12x72xf32>
    %cst_19 = arith.constant dense<0.000000e+00> : vector<12x72xf32>
    %44 = tpu.matmul %42, %28, %cst_19 {dimension_numbers = #tpu.dot_dimension_numbers<[1], [0], [0], [1], [0, 0, 1, 1], [], []>} : vector<12x24xf32>, vector<24x72xf32>, vector<12x72xf32> -> vector<12x72xf32>
    %45 = arith.maximumf %43, %44 : vector<12x72xf32>
    %c0_20 = arith.constant 0 : index
    %c0_21 = arith.constant 0 : index
    %46 = vector.load %arg3[%c0_20, %c0_21] : memref<1x72xf32, #tpu.memory_space<vmem>>, vector<1x72xf32>
    %47 = vector.broadcast %46 : vector<1x72xf32> to vector<12x72xf32>
    %48 = arith.addf %45, %47 : vector<12x72xf32>
    %cst_22 = arith.constant 0.00999999977 : f32
    %49 = vector.broadcast %cst_22 : f32 to vector<12x72xf32>
    %50 = arith.mulf %49, %48 : vector<12x72xf32>
    %51 = arith.maximumf %48, %50 : vector<12x72xf32>
    %52 = vector.extract_strided_slice %51 {offsets = [0, 0], sizes = [8, 72], strides = [1, 1]} : vector<12x72xf32> to vector<8x72xf32>
    %c0_23 = arith.constant 0 : index
    %c0_24 = arith.constant 0 : index
    %c0_25 = arith.constant 0 : index
    %53 = vector.load %arg4[%c0_23, %c0_24, %c0_25] : memref<5x72x72xf32, #tpu.memory_space<vmem>>, vector<1x72x72xf32>
    %54 = vector.shape_cast %53 : vector<1x72x72xf32> to vector<72x72xf32>
    %cst_26 = arith.constant dense<0.000000e+00> : vector<8x72xf32>
    %55 = tpu.matmul %52, %54, %cst_26 {dimension_numbers = #tpu.dot_dimension_numbers<[1], [0], [0], [1], [0, 0, 1, 1], [], []>} : vector<8x72xf32>, vector<72x72xf32>, vector<8x72xf32> -> vector<8x72xf32>
    %56 = vector.extract_strided_slice %51 {offsets = [1, 0], sizes = [8, 72], strides = [1, 1]} : vector<12x72xf32> to vector<8x72xf32>
    %c1_27 = arith.constant 1 : index
    %c0_28 = arith.constant 0 : index
    %c0_29 = arith.constant 0 : index
    %57 = vector.load %arg4[%c1_27, %c0_28, %c0_29] : memref<5x72x72xf32, #tpu.memory_space<vmem>>, vector<1x72x72xf32>
    %58 = vector.shape_cast %57 : vector<1x72x72xf32> to vector<72x72xf32>
    %cst_30 = arith.constant dense<0.000000e+00> : vector<8x72xf32>
    %59 = tpu.matmul %56, %58, %cst_30 {dimension_numbers = #tpu.dot_dimension_numbers<[1], [0], [0], [1], [0, 0, 1, 1], [], []>} : vector<8x72xf32>, vector<72x72xf32>, vector<8x72xf32> -> vector<8x72xf32>
    %60 = arith.addf %55, %59 : vector<8x72xf32>
    %61 = vector.extract_strided_slice %51 {offsets = [2, 0], sizes = [8, 72], strides = [1, 1]} : vector<12x72xf32> to vector<8x72xf32>
    %c2_31 = arith.constant 2 : index
    %c0_32 = arith.constant 0 : index
    %c0_33 = arith.constant 0 : index
    %62 = vector.load %arg4[%c2_31, %c0_32, %c0_33] : memref<5x72x72xf32, #tpu.memory_space<vmem>>, vector<1x72x72xf32>
    %63 = vector.shape_cast %62 : vector<1x72x72xf32> to vector<72x72xf32>
    %cst_34 = arith.constant dense<0.000000e+00> : vector<8x72xf32>
    %64 = tpu.matmul %61, %63, %cst_34 {dimension_numbers = #tpu.dot_dimension_numbers<[1], [0], [0], [1], [0, 0, 1, 1], [], []>} : vector<8x72xf32>, vector<72x72xf32>, vector<8x72xf32> -> vector<8x72xf32>
    %65 = arith.addf %60, %64 : vector<8x72xf32>
    %66 = vector.extract_strided_slice %51 {offsets = [3, 0], sizes = [8, 72], strides = [1, 1]} : vector<12x72xf32> to vector<8x72xf32>
    %c3_35 = arith.constant 3 : index
    %c0_36 = arith.constant 0 : index
    %c0_37 = arith.constant 0 : index
    %67 = vector.load %arg4[%c3_35, %c0_36, %c0_37] : memref<5x72x72xf32, #tpu.memory_space<vmem>>, vector<1x72x72xf32>
    %68 = vector.shape_cast %67 : vector<1x72x72xf32> to vector<72x72xf32>
    %cst_38 = arith.constant dense<0.000000e+00> : vector<8x72xf32>
    %69 = tpu.matmul %66, %68, %cst_38 {dimension_numbers = #tpu.dot_dimension_numbers<[1], [0], [0], [1], [0, 0, 1, 1], [], []>} : vector<8x72xf32>, vector<72x72xf32>, vector<8x72xf32> -> vector<8x72xf32>
    %70 = arith.addf %65, %69 : vector<8x72xf32>
    %71 = vector.extract_strided_slice %51 {offsets = [4, 0], sizes = [8, 72], strides = [1, 1]} : vector<12x72xf32> to vector<8x72xf32>
    %c4_39 = arith.constant 4 : index
    %c0_40 = arith.constant 0 : index
    %c0_41 = arith.constant 0 : index
    %72 = vector.load %arg4[%c4_39, %c0_40, %c0_41] : memref<5x72x72xf32, #tpu.memory_space<vmem>>, vector<1x72x72xf32>
    %73 = vector.shape_cast %72 : vector<1x72x72xf32> to vector<72x72xf32>
    %cst_42 = arith.constant dense<0.000000e+00> : vector<8x72xf32>
    %74 = tpu.matmul %71, %73, %cst_42 {dimension_numbers = #tpu.dot_dimension_numbers<[1], [0], [0], [1], [0, 0, 1, 1], [], []>} : vector<8x72xf32>, vector<72x72xf32>, vector<8x72xf32> -> vector<8x72xf32>
    %75 = arith.addf %70, %74 : vector<8x72xf32>
    %76 = vector.extract_strided_slice %75 {offsets = [0, 0], sizes = [8, 36], strides = [1, 1]} : vector<8x72xf32> to vector<8x36xf32>
    %77 = vector.extract_strided_slice %75 {offsets = [0, 36], sizes = [8, 36], strides = [1, 1]} : vector<8x72xf32> to vector<8x36xf32>
    %78 = arith.maximumf %76, %77 : vector<8x36xf32>
    %79 = tpu.iota {dimensions = array<i32: 0>} : vector<4x8xi32>
    %80 = tpu.iota {dimensions = array<i32: 1>} : vector<4x8xi32>
    %c2_i32_43 = arith.constant 2 : i32
    %81 = vector.broadcast %c2_i32_43 : i32 to vector<4x8xi32>
    %82 = arith.muli %81, %79 : vector<4x8xi32>
    %83 = arith.cmpi eq, %80, %82 : vector<4x8xi32>
    %84 = arith.extui %83 : vector<4x8xi1> to vector<4x8xi32>
    %85 = arith.sitofp %84 : vector<4x8xi32> to vector<4x8xf32>
    %c2_i32_44 = arith.constant 2 : i32
    %86 = vector.broadcast %c2_i32_44 : i32 to vector<4x8xi32>
    %87 = arith.muli %86, %79 : vector<4x8xi32>
    %c1_i32_45 = arith.constant 1 : i32
    %88 = vector.broadcast %c1_i32_45 : i32 to vector<4x8xi32>
    %89 = arith.addi %87, %88 : vector<4x8xi32>
    %90 = arith.cmpi eq, %80, %89 : vector<4x8xi32>
    %91 = arith.extui %90 : vector<4x8xi1> to vector<4x8xi32>
    %92 = arith.sitofp %91 : vector<4x8xi32> to vector<4x8xf32>
    %cst_46 = arith.constant dense<0.000000e+00> : vector<4x36xf32>
    %93 = tpu.matmul %85, %78, %cst_46 {dimension_numbers = #tpu.dot_dimension_numbers<[1], [0], [0], [1], [0, 0, 1, 1], [], []>} : vector<4x8xf32>, vector<8x36xf32>, vector<4x36xf32> -> vector<4x36xf32>
    %cst_47 = arith.constant dense<0.000000e+00> : vector<4x36xf32>
    %94 = tpu.matmul %92, %78, %cst_47 {dimension_numbers = #tpu.dot_dimension_numbers<[1], [0], [0], [1], [0, 0, 1, 1], [], []>} : vector<4x8xf32>, vector<8x36xf32>, vector<4x36xf32> -> vector<4x36xf32>
    %95 = arith.maximumf %93, %94 : vector<4x36xf32>
    %c0_48 = arith.constant 0 : index
    %c0_49 = arith.constant 0 : index
    %96 = vector.load %arg5[%c0_48, %c0_49] : memref<1x36xf32, #tpu.memory_space<vmem>>, vector<1x36xf32>
    %97 = vector.broadcast %96 : vector<1x36xf32> to vector<4x36xf32>
    %98 = arith.addf %95, %97 : vector<4x36xf32>
    %cst_50 = arith.constant 0.00999999977 : f32
    %99 = vector.broadcast %cst_50 : f32 to vector<4x36xf32>
    %100 = arith.mulf %99, %98 : vector<4x36xf32>
    %101 = arith.maximumf %98, %100 : vector<4x36xf32>
    %102 = vector.extract_strided_slice %101 {offsets = [0, 0], sizes = [3, 36], strides = [1, 1]} : vector<4x36xf32> to vector<3x36xf32>
    %c0_51 = arith.constant 0 : index
    %c0_52 = arith.constant 0 : index
    %c0_53 = arith.constant 0 : index
    %103 = vector.load %arg6[%c0_51, %c0_52, %c0_53] : memref<2x36x18xf32, #tpu.memory_space<vmem>>, vector<1x36x18xf32>
    %104 = vector.shape_cast %103 : vector<1x36x18xf32> to vector<36x18xf32>
    %cst_54 = arith.constant dense<0.000000e+00> : vector<3x18xf32>
    %105 = tpu.matmul %102, %104, %cst_54 {dimension_numbers = #tpu.dot_dimension_numbers<[1], [0], [0], [1], [0, 0, 1, 1], [], []>} : vector<3x36xf32>, vector<36x18xf32>, vector<3x18xf32> -> vector<3x18xf32>
    %106 = vector.extract_strided_slice %101 {offsets = [1, 0], sizes = [3, 36], strides = [1, 1]} : vector<4x36xf32> to vector<3x36xf32>
    %c1_55 = arith.constant 1 : index
    %c0_56 = arith.constant 0 : index
    %c0_57 = arith.constant 0 : index
    %107 = vector.load %arg6[%c1_55, %c0_56, %c0_57] : memref<2x36x18xf32, #tpu.memory_space<vmem>>, vector<1x36x18xf32>
    %108 = vector.shape_cast %107 : vector<1x36x18xf32> to vector<36x18xf32>
    %cst_58 = arith.constant dense<0.000000e+00> : vector<3x18xf32>
    %109 = tpu.matmul %106, %108, %cst_58 {dimension_numbers = #tpu.dot_dimension_numbers<[1], [0], [0], [1], [0, 0, 1, 1], [], []>} : vector<3x36xf32>, vector<36x18xf32>, vector<3x18xf32> -> vector<3x18xf32>
    %110 = arith.addf %105, %109 : vector<3x18xf32>
    %c0_59 = arith.constant 0 : index
    %c0_60 = arith.constant 0 : index
    %111 = vector.load %arg7[%c0_59, %c0_60] : memref<1x18xf32, #tpu.memory_space<vmem>>, vector<1x18xf32>
    %112 = vector.broadcast %111 : vector<1x18xf32> to vector<3x18xf32>
    %113 = arith.addf %110, %112 : vector<3x18xf32>
    %cst_61 = arith.constant 0.00999999977 : f32
    %114 = vector.broadcast %cst_61 : f32 to vector<3x18xf32>
    %115 = arith.mulf %114, %113 : vector<3x18xf32>
    %116 = arith.maximumf %113, %115 : vector<3x18xf32>
    %c0_62 = arith.constant 0 : index
    %c0_63 = arith.constant 0 : index
    %117 = vector.load %arg9[%c0_62, %c0_63] : memref<1x20xf32, #tpu.memory_space<vmem>>, vector<1x20xf32>
    %118 = vector.extract_strided_slice %116 {offsets = [0, 0], sizes = [1, 18], strides = [1, 1]} : vector<3x18xf32> to vector<1x18xf32>
    %c0_64 = arith.constant 0 : index
    %c0_65 = arith.constant 0 : index
    %c0_66 = arith.constant 0 : index
    %119 = vector.load %arg8[%c0_64, %c0_65, %c0_66] : memref<3x18x20xf32, #tpu.memory_space<vmem>>, vector<1x18x20xf32>
    %120 = vector.shape_cast %119 : vector<1x18x20xf32> to vector<18x20xf32>
    %cst_67 = arith.constant dense<0.000000e+00> : vector<1x20xf32>
    %121 = tpu.matmul %118, %120, %cst_67 {dimension_numbers = #tpu.dot_dimension_numbers<[1], [0], [0], [1], [0, 0, 1, 1], [], []>} : vector<1x18xf32>, vector<18x20xf32>, vector<1x20xf32> -> vector<1x20xf32>
    %122 = arith.addf %117, %121 : vector<1x20xf32>
    %123 = vector.extract_strided_slice %116 {offsets = [1, 0], sizes = [1, 18], strides = [1, 1]} : vector<3x18xf32> to vector<1x18xf32>
    %c1_68 = arith.constant 1 : index
    %c0_69 = arith.constant 0 : index
    %c0_70 = arith.constant 0 : index
    %124 = vector.load %arg8[%c1_68, %c0_69, %c0_70] : memref<3x18x20xf32, #tpu.memory_space<vmem>>, vector<1x18x20xf32>
    %125 = vector.shape_cast %124 : vector<1x18x20xf32> to vector<18x20xf32>
    %cst_71 = arith.constant dense<0.000000e+00> : vector<1x20xf32>
    %126 = tpu.matmul %123, %125, %cst_71 {dimension_numbers = #tpu.dot_dimension_numbers<[1], [0], [0], [1], [0, 0, 1, 1], [], []>} : vector<1x18xf32>, vector<18x20xf32>, vector<1x20xf32> -> vector<1x20xf32>
    %127 = arith.addf %122, %126 : vector<1x20xf32>
    %128 = vector.extract_strided_slice %116 {offsets = [2, 0], sizes = [1, 18], strides = [1, 1]} : vector<3x18xf32> to vector<1x18xf32>
    %c2_72 = arith.constant 2 : index
    %c0_73 = arith.constant 0 : index
    %c0_74 = arith.constant 0 : index
    %129 = vector.load %arg8[%c2_72, %c0_73, %c0_74] : memref<3x18x20xf32, #tpu.memory_space<vmem>>, vector<1x18x20xf32>
    %130 = vector.shape_cast %129 : vector<1x18x20xf32> to vector<18x20xf32>
    %cst_75 = arith.constant dense<0.000000e+00> : vector<1x20xf32>
    %131 = tpu.matmul %128, %130, %cst_75 {dimension_numbers = #tpu.dot_dimension_numbers<[1], [0], [0], [1], [0, 0, 1, 1], [], []>} : vector<1x18xf32>, vector<18x20xf32>, vector<1x20xf32> -> vector<1x20xf32>
    %132 = arith.addf %127, %131 : vector<1x20xf32>
    %cst_76 = arith.constant 0.00999999977 : f32
    %133 = vector.broadcast %cst_76 : f32 to vector<1x20xf32>
    %134 = arith.mulf %133, %132 : vector<1x20xf32>
    %135 = arith.maximumf %132, %134 : vector<1x20xf32>
    %c0_77 = arith.constant 0 : index
    %c0_78 = arith.constant 0 : index
    %136 = vector.load %arg10[%c0_77, %c0_78] : memref<20x10xf32, #tpu.memory_space<vmem>>, vector<20x10xf32>
    %cst_79 = arith.constant dense<0.000000e+00> : vector<1x10xf32>
    %137 = tpu.matmul %135, %136, %cst_79 {dimension_numbers = #tpu.dot_dimension_numbers<[1], [0], [0], [1], [0, 0, 1, 1], [], []>} : vector<1x20xf32>, vector<20x10xf32>, vector<1x10xf32> -> vector<1x10xf32>
    %c0_80 = arith.constant 0 : index
    %c0_81 = arith.constant 0 : index
    %138 = vector.load %arg11[%c0_80, %c0_81] : memref<1x10xf32, #tpu.memory_space<vmem>>, vector<1x10xf32>
    %139 = arith.addf %137, %138 : vector<1x10xf32>
    %c0_82 = arith.constant 0 : index
    %c0_83 = arith.constant 0 : index
    %c0_84 = arith.constant 0 : index
    %140 = vector.load %arg12[%c0_82, %c0_83, %c0_84] : memref<1x1x10xf32, #tpu.memory_space<vmem>>, vector<1x1x10xf32>
    %141 = vector.shape_cast %140 : vector<1x1x10xf32> to vector<1x10xf32>
    %142 = vector.shape_cast %139 : vector<1x10xf32> to vector<1x1x10xf32>
    tpu.vector_store %arg12[%c0_82, %c0_83, %c0_84], %142 {strides = array<i32>} : memref<1x1x10xf32, #tpu.memory_space<vmem>>, vector<1x1x10xf32>,
    return
  }
  func.func @transform_0(%arg0: i32) -> (i32, i32, i32) {
    %c0_i32 = arith.constant 0 : i32
    %c0_i32_0 = arith.constant 0 : i32
    %c0_i32_1 = arith.constant 0 : i32
    return %arg0, %c0_i32, %c0_i32_0 : i32, i32, i32
  }
  func.func @transform_1(%arg0: i32) -> (i32, i32, i32) {
    %c0_i32 = arith.constant 0 : i32
    %c0_i32_0 = arith.constant 0 : i32
    %c0_i32_1 = arith.constant 0 : i32
    %c0_i32_2 = arith.constant 0 : i32
    return %c0_i32, %c0_i32_0, %c0_i32_1 : i32, i32, i32
  }
  func.func @transform_2(%arg0: i32) -> (i32, i32) {
    %c0_i32 = arith.constant 0 : i32
    %c0_i32_0 = arith.constant 0 : i32
    %c0_i32_1 = arith.constant 0 : i32
    return %c0_i32, %c0_i32_0 : i32, i32
  }
  func.func @transform_3(%arg0: i32) -> (i32, i32, i32) {
    %c0_i32 = arith.constant 0 : i32
    %c0_i32_0 = arith.constant 0 : i32
    %c0_i32_1 = arith.constant 0 : i32
    %c0_i32_2 = arith.constant 0 : i32
    return %c0_i32, %c0_i32_0, %c0_i32_1 : i32, i32, i32
  }
  func.func @transform_4(%arg0: i32) -> (i32, i32) {
    %c0_i32 = arith.constant 0 : i32
    %c0_i32_0 = arith.constant 0 : i32
    %c0_i32_1 = arith.constant 0 : i32
    return %c0_i32, %c0_i32_0 : i32, i32
  }
  func.func @transform_5(%arg0: i32) -> (i32, i32, i32) {
    %c0_i32 = arith.constant 0 : i32
    %c0_i32_0 = arith.constant 0 : i32
    %c0_i32_1 = arith.constant 0 : i32
    %c0_i32_2 = arith.constant 0 : i32
    return %c0_i32, %c0_i32_0, %c0_i32_1 : i32, i32, i32
  }
  func.func @transform_6(%arg0: i32) -> (i32, i32) {
    %c0_i32 = arith.constant 0 : i32
    %c0_i32_0 = arith.constant 0 : i32
    %c0_i32_1 = arith.constant 0 : i32
    return %c0_i32, %c0_i32_0 : i32, i32
  }
  func.func @transform_7(%arg0: i32) -> (i32, i32, i32) {
    %c0_i32 = arith.constant 0 : i32
    %c0_i32_0 = arith.constant 0 : i32
    %c0_i32_1 = arith.constant 0 : i32
    %c0_i32_2 = arith.constant 0 : i32
    return %c0_i32, %c0_i32_0, %c0_i32_1 : i32, i32, i32
  }
  func.func @transform_8(%arg0: i32) -> (i32, i32) {
    %c0_i32 = arith.constant 0 : i32
    %c0_i32_0 = arith.constant 0 : i32
    %c0_i32_1 = arith.constant 0 : i32
    return %c0_i32, %c0_i32_0 : i32, i32
  }
  func.func @transform_9(%arg0: i32) -> (i32, i32) {
    %c0_i32 = arith.constant 0 : i32
    %c0_i32_0 = arith.constant 0 : i32
    %c0_i32_1 = arith.constant 0 : i32
    return %c0_i32, %c0_i32_0 : i32, i32
  }
  func.func @transform_10(%arg0: i32) -> (i32, i32) {
    %c0_i32 = arith.constant 0 : i32
    %c0_i32_0 = arith.constant 0 : i32
    %c0_i32_1 = arith.constant 0 : i32
    return %c0_i32, %c0_i32_0 : i32, i32
  }
  func.func @transform_11(%arg0: i32) -> (i32, i32, i32) {
    %c0_i32 = arith.constant 0 : i32
    %c0_i32_0 = arith.constant 0 : i32
    %c0_i32_1 = arith.constant 0 : i32
    return %arg0, %c0_i32, %c0_i32_0 : i32, i32, i32
  }
}

</mosaic_0001>

<bundles_post_ra>
// kernel: cnn2_forward.1
= control target key start
LH: loop header
LB: loop body
LE: loop exit
PB: predicated region body
PF: predicated region fallthrough
CT: control target
= control target key end

     0   :  { %16 = vsyncpa [#allocation3], 0  ;;  %s4173_s0 = inlined_call_operand.vmem [shape: f32[2,28,84], index: 0, kind: input, shape index: {}]   ;;  %s4174_s1 = inlined_call_operand.vmem [shape: f32[5,84,144], index: 1, kind: input, shape index: {}]   ;;  %s4175_s2 = inlined_call_operand.vmem [shape: f32[1,72], index: 2, kind: input, shape index: {}]   ;;  %s4176_s3 = inlined_call_operand.vmem [shape: f32[5,72,72], index: 3, kind: input, shape index: {}]   ;;  %s4177_s4 = inlined_call_operand.vmem [shape: f32[1,36], index: 4, kind: input, shape index: {}]   ;;  %s4178_s5 = inlined_call_operand.vmem [shape: f32[2,36,18], index: 5, kind: input, shape index: {}]   ;;  %s4179_s6 = inlined_call_operand.vmem [shape: f32[1,18], index: 6, kind: input, shape index: {}]   ;;  %s4180_s7 = inlined_call_operand.vmem [shape: f32[3,18,20], index: 7, kind: input, shape index: {}]   ;;  %s4181_s8 = inlined_call_operand.vmem [shape: f32[1,20], index: 8, kind: input, shape index: {}]   ;;  %s4182_s9 = inlined_call_operand.vmem [shape: f32[20,10], index: 9, kind: input, shape index: {}]   ;;  %s4183_s10 = inlined_call_operand.vmem [shape: f32[1,10], index: 10, kind: input, shape index: {}]   ;;  %s4184_s11 = inlined_call_operand.hbm [shape: f32[2,1,10], index: 11, kind: output, shape index: {}]  }
   0x1   :  { %18 = vsyncpa [#allocation3 + $0x1], 0  ;;  %s3318_s17 = smov 0   ;;  %s3320_s18 = smov 0  }
   0x2   :  { %s3322_s19 = smov 0   ;;  %s3324_s20 = smov 0  }
   0x3 LB: > { %4186 = sst [smem:[#allocation5_spill]] %s3246_s19  ;;  %s3339_s21 = sadd.s32 4294967295, %s3250_s20   ;;  %s3250_s20 = sphi %s3324_s20, %s4196_s20   ;;  %s3246_s19 = sphi %s3322_s19, %s4193_s19   ;;  %s3242_s18 = sphi %s3320_s18, %s4195_s18   ;;  %s3238_s17 = sphi %s3318_s17, %s4194_s17  }
   0x4   : > { %s2419_s22 = sadd.s32 4294967294, %s3250_s20   ;;  %s3343_s23 = sadd.s32 1, %s3250_s20  }
   0x5   : > { %s267_s24 = sadd.s32 1, %s3246_s19  ;;  %s264_s25 = ssub.s32 %s3250_s20, %s3343_s23 }
   0x6   : > { %p277_p0 = scmp.ne.s32.totalorder %s3246_s19, %s3242_s18  ;;  %p265_p1 = scmp.eq.s32.totalorder %s264_s25, 0 }
   0x7   : > { %p278_p2 = scmp.eq.s32.totalorder %s3339_s21, 1  ;;  %p283_p3 = scmp.ne.s32.totalorder %s3242_s18, %s3238_s17 }
   0x8   : > { %p284_p4 = scmp.eq.s32.totalorder %s2419_s22, 1  ;;  %p2422_p7 = scmp.ge.s32.totalorder %s3250_s20, 1 }
   0x9   : > { %s3354_s26 = scalar_select %p265_p1, %s3246_s19, %s267_s24  }
   0xa   : > { %p3356_p5 = por %p278_p2, %p277_p0  ;;  %p3360_p6 = por %p284_p4, %p283_p3 }
   0xb   : > { %4187 = sst [smem:[#allocation6_spill]] %s3354_s26  ;;  %p340_p8 = scmp.lt.s32.totalorder %s3250_s20, 3 }
   0xd   : > { %p341_p9 = pnand %p2422_p7, %p340_p8 }
   0xe   : > { %v2426_v0 = vld [vmem:[%s4174_s1 + $0xb8] sm:$0xff] (!%p341_p9)  ;;  %v2428_v1 = vld [vmem:[%s4174_s1 + $0xc8] sm:$0xff] (!%p341_p9)  ;;  %v2425_v2 = vld [vmem:[%s4174_s1 + $0xb0] sm:$0xff] (!%p341_p9)  ;;  %p379_p10 = scmp.lt.s32.totalorder (!%p341_p9), %s3339_s21, 1  ;;  %v3252_v7 = vmov (!%p341_p9), 0.0   ;;  %vm792_vm0 = vcmask (!%p341_p9), 1044480  }
   0xf   : > { %344 = sbr.rel (%p341_p9) target bundleno = 2008 (0x7d8), region = 64  ;;  %v2906_v3 = vpack.c.bf16 (!%p341_p9), %v2428_v1, %v2426_v0  ;;  %v2427_v4 = vld [vmem:[%s4174_s1 + $0xc0] sm:$0xff] (!%p341_p9)  ;;  %v2430_v5 = vld [vmem:[%s4174_s1 + $0xd8] sm:$0xff] (!%p341_p9)  ;;  %v2432_v6 = vld [vmem:[%s4174_s1 + $0xe8] sm:$0xff] (!%p341_p9)  ;;  %523 = vmatprep.mubr.f32.mxu0 (!%p341_p9), %v3252_v7  ;;  %vm452_vm1 = vcmask (!%p341_p9), 1043456   ;;  %vm437_vm2 = vcmask (!%p341_p9), 1046528  }
  0x10   : > { %v2908_v8 = vpack.c.bf16 (!%p341_p9), %v2427_v4, %v2425_v2  ;;  %v2910_v9 = vpack.c.bf16 (!%p341_p9), %v2432_v6, %v2430_v5  ;;  %v2429_v10 = vld [vmem:[%s4174_s1 + $0xd0] sm:$0xff] (!%p341_p9)  ;;  %v2431_v11 = vld [vmem:[%s4174_s1 + $0xe0] sm:$0xff] (!%p341_p9)  ;;  %v2434_v12 = vld [vmem:[%s4174_s1 + $0xf8] sm:$0xff] (!%p341_p9)  ;;  %vm445_vm3 = vcmask (!%p341_p9), 687104   ;;  %vm660_vm4 = vcmask (!%p341_p9), 1045504   ;;  %s3253_s13 = smov (!%p341_p9), 56  }
  0x11   : > { %2907 = vmatprep.subr.bf16.mxu0 (!%p341_p9), %v2906_v3  ;;  %v2436_v13 = vld [vmem:[%s4174_s1 + $0x108] sm:$0xff] (!%p341_p9)  ;;  %v2912_v14 = vpack.c.bf16 (!%p341_p9), %v2431_v11, %v2429_v10  ;;  %v2433_v16 = vld [vmem:[%s4174_s1 + $0xf0] sm:$0xff] (!%p341_p9)  ;;  %v2435_v17 = vld [vmem:[%s4174_s1 + $0x100] sm:$0xff] (!%p341_p9)  ;;  %vm1081_vm6 = vcmask (!%p341_p9), 195584   ;;  %vm1050_vm10 = vcmask (!%p341_p9), 457728   ;;  %vm3255_vm11 = vmmov (!%p341_p9), 0  }
  0x12   : > { %2909 = vmatpush1.bf16.msra.mxu0 (!%p341_p9), %v2908_v8  ;;  %v2914_v15 = vpack.c.bf16 (!%p341_p9), %v2436_v13, %v2434_v12  ;;  %v2438_v18 = vld [vmem:[%s4174_s1 + $0x118] sm:$0xff] (!%p341_p9)  ;;  %v2440_v19 = vld [vmem:[%s4174_s1 + $0x128] sm:$0xff] (!%p341_p9)  ;;  %v2916_v20 = vpack.c.bf16 (!%p341_p9), %v2435_v17, %v2433_v16  ;;  %v2437_v22 = vld [vmem:[%s4174_s1 + $0x110] sm:$0xff] (!%p341_p9)  ;;  %vm1283_vm12 = vcmask (!%p341_p9), 588800   ;;  %s3256_s29 = smov (!%p341_p9), 92   ;;  %vm1691_vm13 = vcmask (!%p341_p9), 64512  }
  0x13   : > { %2911 = vmatprep.subr.bf16.mxu0 (!%p341_p9), %v2910_v9  ;;  %v2918_v21 = vpack.c.bf16 (!%p341_p9), %v2440_v19, %v2438_v18  ;;  %v2439_v23 = vld [vmem:[%s4174_s1 + $0x120] sm:$0xff] (!%p341_p9)  ;;  %v2442_v25 = vld [vmem:[%s4174_s1 + $0x138] sm:$0xff] (!%p341_p9)  ;;  %v2444_v26 = vld [vmem:[%s4174_s1 + $0x148] sm:$0xff] (!%p341_p9)  ;;  %vm1860_vm14 = vcmask (!%p341_p9), 293888   ;;  %vm2029_vm15 = vcmask (!%p341_p9), 1041408   ;;  %s2615_s26 = sshll.u32 (!%p341_p9), %s3339_s21, 4 }
  0x14   : > { %v2920_v31 = vpack.c.bf16 (!%p341_p9), %v2439_v23, %v2437_v22  ;;  %v2922_v33 = vpack.c.bf16 (!%p341_p9), %v2444_v26, %v2442_v25  ;;  %v2441_v34 = vld [vmem:[%s4174_s1 + $0x130] sm:$0xff] (!%p341_p9)  ;;  %v2443_v35 = vld [vmem:[%s4174_s1 + $0x140] sm:$0xff] (!%p341_p9)  ;;  %v2446_v45 = vld [vmem:[%s4174_s1 + $0x158] sm:$0xf] (!%p341_p9)  ;;  %s4131_s25 = scalar_lea.hbm (!%p341_p9), %s4184_s11, %s2615_s26 }
  0x15   : > { %v2924_v40 = vpack.c.bf16 (!%p341_p9), %v2443_v35, %v2441_v34  ;;  %v389_v46 = vld [vmem:[%s4174_s1 + $0x8] sm:$0xff] (!%p341_p9)  ;;  %v391_v47 = vld [vmem:[%s4174_s1 + $0x18] sm:$0xff] (!%p341_p9)  ;;  %v388_v50 = vld [vmem:[%s4174_s1] sm:$0xff] (!%p341_p9) }
  0x16   : > { %s380_s24 = scalar_select %p379_p10, %s3339_s21, 1  ;;  %2913 = vmatpush1.bf16.msra.mxu0 %v2912_v14  ;;  %v390_v51 = vld [vmem:[%s4174_s1 + $0x10] sm:$0xff]  ;;  %v393_v55 = vld [vmem:[%s4174_s1 + $0x28] sm:$0xff]  ;;  %v395_v56 = vld [vmem:[%s4174_s1 + $0x38] sm:$0xff]  ;;  %v2926_v58 = vpack.c.bf16 %v391_v47, %v389_v46 }
  0x17   : > { %2915 = vmatprep.subr.bf16.mxu0 %v2914_v15  ;;  %v2445_v57 = vld [vmem:[%s4174_s1 + $0x150] sm:$0xf]  ;;  %v2928_v61 = vpack.c.bf16 %v390_v51, %v388_v50  ;;  %v2930_v63 = vpack.c.bf16 %v395_v56, %v393_v55  ;;  %v392_v0 = vld [vmem:[%s4174_s1 + $0x20] sm:$0xff]  ;;  %v397_v2 = vld [vmem:[%s4174_s1 + $0x48] sm:$0xff]  ;;  %s3257_s21 = smov [#allocation2]  }
  0x18   : > { %s2618_s30 = sshll.u32 %s380_s24, 5  ;;  %v394_v1 = vld [vmem:[%s4174_s1 + $0x30] sm:$0xff]  ;;  %v399_v3 = vld [vmem:[%s4174_s1 + $0x58] sm:$0xff]  ;;  %v396_v9 = vld [vmem:[%s4174_s1 + $0x40] sm:$0xff]  ;;  %s3192_s12 = sshll.u32 %s3257_s21, 4  ;;  %s3193_s12 = int_to_ptr.vmem [resolvable:$false] %s3192_s12 }
  0x19   : > { %s383_s19 = scalar_lea.vmem %s4173_s0, %s2618_s30  ;;  %v2932_v4 = vpack.c.bf16 %v394_v1, %v392_v0  ;;  %v2934_v8 = vpack.c.bf16 %v399_v3, %v397_v2  ;;  %v398_v10 = vld [vmem:[%s4174_s1 + $0x50] sm:$0xff]  ;;  %v401_v11 = vld [vmem:[%s4174_s1 + $0x68] sm:$0xff]  ;;  %v403_v12 = vld [vmem:[%s4174_s1 + $0x78] sm:$0xff]  ;;  %s3194_s14 = scalar_lea.vmem %s3193_s12, 32 }
  0x1a   : > { %v3420_v24 = vld [vmem:[%s383_s19] sm:$0xff]  ;;  %v3428_v27 = vld [vmem:[%s383_s19 + $0x8] sm:$0xff]  ;;  %2917 = vmatpush1.bf16.msra.mxu0 %v2916_v20  ;;  %v3440_v36 = vld [vmem:[%s383_s19 + $0x10] sm:$0xff]  ;;  %v2936_v13 = vpack.c.bf16 %v398_v10, %v396_v9  ;;  %v2938_v15 = vpack.c.bf16 %v403_v12, %v401_v11 }
  0x1b   : > { %v793_v28 = vrot.slane %v3420_v24, 3  ;;  %v794_v29 = vrot.slane %v3428_v27, 3  ;;  %v924_v30 = vrot.slane %v3420_v24, 4  ;;  %v925_v32 = vrot.slane %v3428_v27, 4  ;;  %2919 = vmatprep.subr.bf16.mxu0 %v2918_v21  ;;  %v3449_v41 = vld [vmem:[%s383_s19 + $0x18] sm:$0xf] }
  0x1c   : > { %v796_v38 = vrot.slane %v3440_v36, 3  ;;  %v798_v43 = vrot.slane %v3449_v41, 3  ;;  %v927_v44 = vrot.slane %v3440_v36, 4  ;;  %v438_v48 = vrot.slane %v3420_v24, 1  ;;  %v400_v16 = vld [vmem:[%s4174_s1 + $0x60] sm:$0xff]  ;;  %v402_v17 = vld [vmem:[%s4174_s1 + $0x70] sm:$0xff] }
  0x1d   : > { %v3443_v37 = vsel %vm792_vm0, %v793_v28, %v794_v29  ;;  %v3447_v39 = vsel %vm452_vm1, %v924_v30, %v925_v32  ;;  %v439_v49 = vrot.slane %v3428_v27, 1  ;;  %v929_v54 = vrot.slane %v3449_v41, 4  ;;  %v405_v18 = vld [vmem:[%s4174_s1 + $0x88] sm:$0xff]  ;;  %v407_v19 = vld [vmem:[%s4174_s1 + $0x98] sm:$0xff]  ;;  %v404_v22 = vld [vmem:[%s4174_s1 + $0x80] sm:$0xff] }
  0x1e   : > { %2921 = vmatpush1.bf16.msra.mxu0 %v2920_v31  ;;  %v3452_v42 = vsel %vm792_vm0, %v794_v29, %v796_v38  ;;  %v3474_v52 = vsel %vm792_vm0, %v796_v38, %v798_v43  ;;  %v3477_v53 = vsel %vm452_vm1, %v925_v32, %v927_v44  ;;  %v441_v62 = vrot.slane %v3440_v36, 1  ;;  %v406_v23 = vld [vmem:[%s4174_s1 + $0x90] sm:$0xff]  ;;  %v409_v26 = vld [vmem:[%s4174_s1 + $0xa8] sm:$0xf]  ;;  %v2460_v29 = vld [vmem:[%s4174_s1 + $0x178] sm:$0xff] }
  0x1f   : > { %2923 = vmatprep.subr.bf16.mxu0 %v2922_v33  ;;  %v3491_v59 = vsel %vm452_vm1, %v927_v44, %v929_v54  ;;  %v440_v60 = vsel %vm437_vm2, %v438_v48, %v439_v49  ;;  %v443_v6 = vrot.slane %v3449_v41, 1  ;;  %v2940_v20 = vpack.c.bf16 %v402_v17, %v400_v16  ;;  %v2458_v28 = vld [vmem:[%s4174_s1 + $0x168] sm:$0xff]  ;;  %v2457_v30 = vld [vmem:[%s4174_s1 + $0x160] sm:$0xff]  ;;  %v2459_v31 = vld [vmem:[%s4174_s1 + $0x170] sm:$0xff] }
  0x20   : > { %v442_v5 = vsel %vm437_vm2, %v439_v49, %v441_v62  ;;  %v2942_v21 = vpack.c.bf16 %v407_v19, %v405_v18  ;;  %v2944_v25 = vpack.c.bf16 %v406_v23, %v404_v22  ;;  %v2462_v32 = vld [vmem:[%s4174_s1 + $0x188] sm:$0xff]  ;;  %v2464_v33 = vld [vmem:[%s4174_s1 + $0x198] sm:$0xff]  ;;  %v408_v34 = vld [vmem:[%s4174_s1 + $0xa0] sm:$0xf]  ;;  %v2946_v35 = vpack.c.bf16 %v2460_v29, %v2458_v28 }
  0x21   : > { %v444_v14 = vsel %vm437_vm2, %v441_v62, %v443_v6  ;;  %v2948_v38 = vpack.c.bf16 %v2459_v31, %v2457_v30  ;;  %v2461_v43 = vld [vmem:[%s4174_s1 + $0x180] sm:$0xff]  ;;  %v2463_v44 = vld [vmem:[%s4174_s1 + $0x190] sm:$0xff]  ;;  %v2468_v46 = vld [vmem:[%s4174_s1 + $0x1b8] sm:$0xff]  ;;  %v661_v6 = vrot.slane %v3420_v24, 2  ;;  %v666_v22 = vrot.slane %v3449_v41, 2 }
  0x22   : > { %2925 = vmatpush1.bf16.msra.mxu0 %v2924_v40  ;;  %v2950_v40 = vpack.c.bf16 %v2464_v33, %v2462_v32  ;;  %v2952_v47 = vpack.c.bf16 %v2463_v44, %v2461_v43  ;;  %v2465_v49 = vld [vmem:[%s4174_s1 + $0x1a0] sm:$0xff]  ;;  %v2467_v50 = vld [vmem:[%s4174_s1 + $0x1b0] sm:$0xff]  ;;  %v2470_v51 = vld [vmem:[%s4174_s1 + $0x1c8] sm:$0xff] }
  0x23   : > { %2447 = vmatprep.subr.msk.mxu0 %vm452_vm1, %v2446_v45  ;;  %v2466_v45 = vld [vmem:[%s4174_s1 + $0x1a8] sm:$0xff]  ;;  %v2472_v54 = vld [vmem:[%s4174_s1 + $0x1d8] sm:$0xff]  ;;  %v2956_v55 = vpack.c.bf16 %v2467_v50, %v2465_v49  ;;  %v2473_v0 = vld [vmem:[%s4174_s1 + $0x1e0] sm:$0xff] }
  0x24   : > { %v2954_v48 = vpack.c.bf16 %v2468_v46, %v2466_v45  ;;  %v2958_v56 = vpack.c.bf16 %v2472_v54, %v2470_v51  ;;  %v2475_v1 = vld [vmem:[%s4174_s1 + $0x1f0] sm:$0xff]  ;;  %v2478_v3 = vld [vmem:[%s4174_s1 + $0x208] sm:$0xf]  ;;  %v2486_v10 = vld [vmem:[%s4174_s1 + $0x220] sm:$0xff] }
  0x25   : > { %v2964_v2 = vpack.c.bf16 %v2475_v1, %v2473_v0  ;;  %v2484_v9 = vld [vmem:[%s4174_s1 + $0x210] sm:$0xff]  ;;  %v2489_v11 = vld [vmem:[%s4174_s1 + $0x238] sm:$0xff]  ;;  %v2490_v18 = vld [vmem:[%s4174_s1 + $0x240] sm:$0xff] }
  0x26   : > { %2448 = vmatpush1.msk.msra.mxu0 %vm452_vm1, %v2445_v57  ;;  %v2469_v57 = vld [vmem:[%s4174_s1 + $0x1c0] sm:$0xff]  ;;  %v2488_v17 = vld [vmem:[%s4174_s1 + $0x230] sm:$0xff]  ;;  %v2493_v19 = vld [vmem:[%s4174_s1 + $0x258] sm:$0xff] }
  0x27   : > { %2927 = vmatprep.subr.bf16.mxu0 %v2926_v58  ;;  %2449 = vmatmul.mubr.msk.f32.vlgmr.msra.gmra.mrb[0].mxu0 %vm445_vm3, %v440_v60  ;;  %v2471_v58 = vld [vmem:[%s4174_s1 + $0x1d0] sm:$0xff]  ;;  %v2474_v60 = vld [vmem:[%s4174_s1 + $0x1e8] sm:$0xff]  ;;  %v2497_v28 = vld [vmem:[%s4174_s1 + $0x278] sm:$0xff] }
  0x28   : > { %2929 = vmatpush1.bf16.msra.mxu0 %v2928_v61  ;;  %529 = vmatprep.mubr.f32.mxu0 %v3252_v7  ;;  %v2476_v61 = vld [vmem:[%s4174_s1 + $0x1f8] sm:$0xff]  ;;  %v2960_v62 = vpack.c.bf16 %v2471_v58, %v2469_v57  ;;  %v2499_v29 = vld [vmem:[%s4174_s1 + $0x288] sm:$0xff]  ;;  %v2496_v32 = vld [vmem:[%s4174_s1 + $0x270] sm:$0xff] }
  0x29   : > { %2931 = vmatprep.subr.bf16.mxu0 %v2930_v63  ;;  %v2962_v63 = vpack.c.bf16 %v2476_v61, %v2474_v60  ;;  %v2978_v31 = vpack.c.bf16 %v2499_v29, %v2497_v28  ;;  %v2498_v33 = vld [vmem:[%s4174_s1 + $0x280] sm:$0xff]  ;;  %v2500_v43 = vld [vmem:[%s4174_s1 + $0x290] sm:$0xff]  ;;  %v2505_v46 = vld [vmem:[%s4174_s1 + $0x2b8] sm:$0xf] }
  0x2a   : > { %v2502_v44 = vld [vmem:[%s4174_s1 + $0x2a0] sm:$0xff]  ;;  %v2513_v50 = vld [vmem:[%s4174_s1 + $0x2d0] sm:$0xff]  ;;  %v2516_v51 = vld [vmem:[%s4174_s1 + $0x2e8] sm:$0xff] }
  0x2b   : > { %2450 = vmatmul.mubr.msk.f32.gmra.mrb[2].mxu0 %vm445_vm3, %v442_v5  ;;  %v2487_v5 = vld [vmem:[%s4174_s1 + $0x228] sm:$0xff]  ;;  %v2984_v45 = vpack.c.bf16 %v2502_v44, %v2500_v43  ;;  %v2511_v49 = vld [vmem:[%s4174_s1 + $0x2c0] sm:$0xff]  ;;  %v2518_v54 = vld [vmem:[%s4174_s1 + $0x2f8] sm:$0xff] }
  0x2c   : > { %2933 = vmatpush1.bf16.msra.mxu0 %v2932_v4  ;;  %535 = vmatprep.mubr.f32.mxu0 %v3252_v7  ;;  %v2485_v4 = vld [vmem:[%s4174_s1 + $0x218] sm:$0xff]  ;;  %v2988_v57 = vpack.c.bf16 %v2513_v50, %v2511_v49  ;;  %v2990_v58 = vpack.c.bf16 %v2518_v54, %v2516_v51  ;;  %v2515_v60 = vld [vmem:[%s4174_s1 + $0x2e0] sm:$0xff]  ;;  %v2517_v61 = vld [vmem:[%s4174_s1 + $0x2f0] sm:$0xff] }
  0x2d   : > { %2935 = vmatprep.subr.bf16.mxu0 %v2934_v8  ;;  %v662_v8 = vrot.slane %v3428_v27, 2  ;;  %v2966_v12 = vpack.c.bf16 %v2487_v5, %v2485_v4  ;;  %v2992_v0 = vpack.c.bf16 %v2517_v61, %v2515_v60  ;;  %v2524_v4 = vld [vmem:[%s4174_s1 + $0x328] sm:$0xff]  ;;  %v2549_v60 = vld [vmem:[%s4176_s3 + $0x58] sm:$0xff]  ;;  %v2550_v61 = vld [vmem:[%s4176_s3 + $0x60] sm:$0xff] }
  0x2f   : > { %2451 = vmatmul.mubr.msk.f32.gmra.mrb[4].mxu0 %vm445_vm3, %v444_v14  ;;  %v2968_v14 = vpack.c.bf16 %v2486_v10, %v2484_v9  ;;  %v2525_v9 = vld [vmem:[%s4174_s1 + $0x330] sm:$0xff]  ;;  %v2528_v10 = vld [vmem:[%s4174_s1 + $0x348] sm:$0xff] }
  0x30   : > { %2937 = vmatpush1.bf16.msra.mxu0 %v2936_v13  ;;  %618 = vmatprep.mubr.f32.mxu0 %v3252_v7  ;;  %v663_v13 = vsel %vm660_vm4, %v661_v6, %v662_v8 }
  0x31   : > { %2939 = vmatprep.subr.bf16.mxu0 %v2938_v15  ;;  %v664_v15 = vrot.slane %v3440_v36, 2 }
  0x33   : > { %v667_v30 = vsel %vm660_vm4, %v664_v15, %v666_v22 }
  0x34   : > { %2941 = vmatpush1.bf16.msra.mxu0 %v2940_v20  ;;  %v2495_v20 = vld [vmem:[%s4174_s1 + $0x268] sm:$0xff] }
  0x35   : > { %2943 = vmatprep.subr.bf16.mxu0 %v2942_v21  ;;  %v665_v21 = vsel %vm660_vm4, %v662_v8, %v664_v15  ;;  %v2974_v23 = vpack.c.bf16 %v2495_v20, %v2493_v19  ;;  %v2523_v8 = vld [vmem:[%s4174_s1 + $0x320] sm:$0xff]  ;;  %v1060_v15 = vlaneseq }
  0x38   : > { %2945 = vmatpush1.bf16.msra.mxu0 %v2944_v25  ;;  %v2492_v25 = vld [vmem:[%s4174_s1 + $0x250] sm:$0xff] }
  0x39   : > { %2452 = vmatprep.subr.msk.mxu0 %vm452_vm1, %v409_v26  ;;  %v2494_v26 = vld [vmem:[%s4174_s1 + $0x260] sm:$0xff] }
  0x3a   : > { %v2976_v41 = vpack.c.bf16 %v2494_v26, %v2492_v25 }
  0x3c   : > { %2453 = vmatpush1.msk.msra.mxu0 %vm452_vm1, %v408_v34  ;;  %v2501_v34 = vld [vmem:[%s4174_s1 + $0x298] sm:$0xff] }
  0x3d   : > { %2947 = vmatprep.subr.bf16.mxu0 %v2946_v35  ;;  %2454 = vmatmul.mubr.msk.f32.vlgmr.msra.gmra.mrb[0].mxu0 %vm445_vm3, %v3420_v24  ;;  %v2491_v24 = vld [vmem:[%s4174_s1 + $0x248] sm:$0xff] }
  0x3e   : > { %2949 = vmatpush1.bf16.msra.mxu0 %v2948_v38  ;;  %624 = vmatprep.mubr.f32.mxu0 %v3252_v7  ;;  %v2970_v16 = vpack.c.bf16 %v2491_v24, %v2489_v11  ;;  %v2503_v35 = vld [vmem:[%s4174_s1 + $0x2a8] sm:$0xff]  ;;  %v2980_v38 = vpack.c.bf16 %v2498_v33, %v2496_v32  ;;  %v3000_v11 = vpack.c.bf16 %v2525_v9, %v2523_v8  ;;  %v2546_v9 = vld [vmem:[%s4175_s2] ss:$0 sm:$0xff] }
  0x3f   : > { %2951 = vmatprep.subr.bf16.mxu0 %v2950_v40  ;;  %v2982_v40 = vpack.c.bf16 %v2503_v35, %v2501_v34 }
  0x41   : > { %2455 = vmatmul.mubr.msk.f32.gmra.mrb[2].mxu0 %vm445_vm3, %v3428_v27  ;;  %v2477_v27 = vld [vmem:[%s4174_s1 + $0x200] sm:$0xf] }
  0x42   : > { %2953 = vmatpush1.bf16.msra.mxu0 %v2952_v47  ;;  %630 = vmatprep.mubr.f32.mxu0 %v3252_v7  ;;  %v2512_v47 = vld [vmem:[%s4174_s1 + $0x2c8] sm:$0xff] }
  0x43   : > { %2955 = vmatprep.subr.bf16.mxu0 %v2954_v48  ;;  %v2514_v48 = vld [vmem:[%s4174_s1 + $0x2d8] sm:$0xff] }
  0x45   : > { %2456 = vmatmul.mubr.msk.f32.gmra.mrb[4].mxu0 %vm445_vm3, %v3440_v36  ;;  %v2972_v36 = vpack.c.bf16 %v2490_v18, %v2488_v17  ;;  %v1061_v17 = vshrl.u32 %v1060_v15, 7 }
  0x46   : > { %2957 = vmatpush1.bf16.msra.mxu0 %v2956_v55  ;;  %744 = vmatprep.mubr.f32.mxu0 %v3252_v7  ;;  %v2504_v55 = vld [vmem:[%s4174_s1 + $0x2b0] sm:$0xf] }
  0x47   : > { %2959 = vmatprep.subr.bf16.mxu0 %v2958_v56  ;;  %v2986_v56 = vpack.c.bf16 %v2514_v48, %v2512_v47  ;;  %v1062_v20 = vadd.s32 8, %v1061_v17 }
  0x49   : > { %v1066_v22 = vmul.u32 2, %v1062_v20 }
  0x4a   : > { %2961 = vmatpush1.bf16.msra.mxu0 %v2960_v62  ;;  %v2520_v62 = vld [vmem:[%s4174_s1 + $0x308] sm:$0xff] }
  0x4b   : > { %2963 = vmatprep.subr.bf16.mxu0 %v2962_v63  ;;  %v2522_v63 = vld [vmem:[%s4174_s1 + $0x318] sm:$0xff]  ;;  %v1074_v29 = vadd.s32 1, %v1066_v22 }
  0x4c   : > { %v2994_v1 = vpack.c.bf16 %v2522_v63, %v2520_v62  ;;  %v3018_v62 = vpack.c.bf16 %v2550_v61, %v2549_v60  ;;  %v2551_v63 = vld [vmem:[%s4176_s3 + $0x68] sm:$0xff]  ;;  %v2568_v60 = vld [vmem:[%s4176_s3 + $0xd8] sm:$0xff]  ;;  %v2569_v61 = vld [vmem:[%s4176_s3 + $0xe0] sm:$0xff] }
  0x4e   : > { %2965 = vmatpush1.bf16.msra.mxu0 %v2964_v2  ;;  %v2519_v2 = vld [vmem:[%s4174_s1 + $0x300] sm:$0xff] }
  0x4f   : > { %2479 = vmatprep.subr.msk.mxu0 %vm452_vm1, %v2478_v3  ;;  %v2521_v3 = vld [vmem:[%s4174_s1 + $0x310] sm:$0xff] }
  0x50   : > { %v2996_v5 = vpack.c.bf16 %v2521_v3, %v2519_v2  ;;  %v2553_v2 = vld [vmem:[%s4176_s3 + $0x78] sm:$0xff]  ;;  %v2554_v3 = vld [vmem:[%s4176_s3 + $0x80] sm:$0xff] }
  0x52   : > { %2480 = vmatpush1.msk.msra.mxu0 %vm452_vm1, %v2477_v27  ;;  %v2527_v27 = vld [vmem:[%s4174_s1 + $0x340] sm:$0xff] }
  0x53   : > { %2967 = vmatprep.subr.bf16.mxu0 %v2966_v12  ;;  %2481 = vmatmul.mubr.msk.f32.vlgmr.msra.gmra.mrb[0].mxu0 %vm445_vm3, %v663_v13  ;;  %v2529_v12 = vld [vmem:[%s4174_s1 + $0x350] sm:$0xff] }
  0x54   : > { %2969 = vmatpush1.bf16.msra.mxu0 %v2968_v14  ;;  %750 = vmatprep.mubr.f32.mxu0 %v3252_v7  ;;  %v3004_v13 = vpack.c.bf16 %v2529_v12, %v2527_v27  ;;  %v2531_v14 = vld [vmem:[%s4174_s1 + $0x360] sm:$0xf] }
  0x55   : > { %2971 = vmatprep.subr.bf16.mxu0 %v2970_v16 }
  0x57   : > { %2482 = vmatmul.mubr.msk.f32.gmra.mrb[2].mxu0 %vm445_vm3, %v665_v21  ;;  %v1065_v21 = vmul.u32 2, %v1061_v17 }
  0x58   : > { %2973 = vmatpush1.bf16.msra.mxu0 %v2972_v36  ;;  %756 = vmatprep.mubr.f32.mxu0 %v3252_v7  ;;  %v1064_v36 = vand.u32 127, %v1060_v15 }
  0x59   : > { %2975 = vmatprep.subr.bf16.mxu0 %v2974_v23  ;;  %v1073_v26 = vadd.s32 1, %v1065_v21 }
  0x5a   : > { %vm1067_vm5 = vcmp.eq.s32.totalorder %v1064_v36, %v1065_v21  ;;  %vm3801_vm7 = vcmp.eq.s32.totalorder %v1064_v36, %v1066_v22  ;;  %vm1076_vm9 = vcmp.eq.s32.totalorder %v1064_v36, %v1074_v29 }
  0x5b   : > { %2483 = vmatmul.mubr.msk.f32.gmra.mrb[4].mxu0 %vm445_vm3, %v667_v30  ;;  %v3799_v25 = vsel %vm1067_vm5, 1.0, %v3252_v7  ;;  %vm1075_vm8 = vcmp.eq.s32.totalorder %v1064_v36, %v1073_v26  ;;  %v2539_v50 = vsel %vm3801_vm7, 1.0, %v3252_v7  ;;  %v2541_v54 = vsel %vm1076_vm9, 1.0, %v3252_v7 }
  0x5c   : > { %2977 = vmatpush1.bf16.msra.mxu0 %v2976_v41  ;;  %876 = vmatprep.mubr.f32.mxu0 %v3252_v7  ;;  %v3812_v51 = vsel %vm1075_vm8, 1.0, %v3252_v7 }
  0x5d   : > { %2979 = vmatprep.subr.bf16.mxu0 %v2978_v31  ;;  %2717 = vmatprep.mubr.msk.f32.mxu1 %vm1081_vm6, %v3799_v25 }
  0x60   : > { %2981 = vmatpush1.bf16.msra.mxu0 %v2980_v38 }
  0x61   : > { %2983 = vmatprep.subr.bf16.mxu0 %v2982_v40 }
  0x64   : > { %2985 = vmatpush1.bf16.msra.mxu0 %v2984_v45 }
  0x65   : > { %2506 = vmatprep.subr.msk.mxu0 %vm452_vm1, %v2505_v46 }
  0x68   : > { %2507 = vmatpush1.msk.msra.mxu0 %vm452_vm1, %v2504_v55  ;;  %v2547_v55 = vld [vmem:[%s4176_s3 + $0x48] sm:$0xff] }
  0x69   : > { %2987 = vmatprep.subr.bf16.mxu0 %v2986_v56  ;;  %2508 = vmatmul.mubr.msk.f32.vlgmr.msra.gmra.mrb[0].mxu0 %vm445_vm3, %v3443_v37  ;;  %v2526_v37 = vld [vmem:[%s4174_s1 + $0x338] sm:$0xff]  ;;  %v2548_v56 = vld [vmem:[%s4176_s3 + $0x50] sm:$0xff] }
  0x6a   : > { %2989 = vmatpush1.bf16.msra.mxu0 %v2988_v57  ;;  %882 = vmatprep.mubr.f32.mxu0 %v3252_v7  ;;  %v2998_v6 = vpack.c.bf16 %v2526_v37, %v2524_v4  ;;  %v3015_v57 = vpack.c.bf16 %v2548_v56, %v2547_v55  ;;  %v3024_v4 = vpack.c.bf16 %v2554_v3, %v2553_v2  ;;  %v2555_v37 = vld [vmem:[%s4176_s3 + $0x88] sm:$0xff]  ;;  %v2564_v55 = vld [vmem:[%s4176_s3 + $0xc0] sm:$0xff]  ;;  %v2572_v3 = vld [vmem:[%s4176_s3 + $0xf8] sm:$0xff] }
  0x6b   : > { %2991 = vmatprep.subr.bf16.mxu0 %v2990_v58  ;;  %v3254_v58 = vmov 0.0|0.0   ;;  %v2565_v56 = vld [vmem:[%s4176_s3 + $0xc8] sm:$0xff] }
  0x6d   : > { %2509 = vmatmul.mubr.msk.f32.gmra.mrb[2].mxu0 %vm445_vm3, %v3452_v42  ;;  %v2530_v42 = vld [vmem:[%s4174_s1 + $0x358] sm:$0xff] }
  0x6e   : > { %2993 = vmatpush1.bf16.msra.mxu0 %v2992_v0  ;;  %888 = vmatprep.mubr.f32.mxu0 %v3252_v7  ;;  %v3002_v24 = vpack.c.bf16 %v2530_v42, %v2528_v10  ;;  %v2552_v0 = vld [vmem:[%s4176_s3 + $0x70] sm:$0xff] }
  0x6f   : > { %2995 = vmatprep.subr.bf16.mxu0 %v2994_v1  ;;  %v3021_v1 = vpack.c.bf16 %v2552_v0, %v2551_v63  ;;  %v3051_v63 = vpack.c.bf16 %v2569_v61, %v2568_v60  ;;  %v2570_v0 = vld [vmem:[%s4176_s3 + $0xe8] sm:$0xff] }
  0x70   : > { %v2605_v60 = vld [vmem:[%s4180_s7 + $0x28] sm:$0x3] }
  0x71   : > { %2510 = vmatmul.mubr.msk.f32.gmra.mrb[4].mxu0 %vm445_vm3, %v3474_v52  ;;  %v2532_v52 = vld [vmem:[%s4174_s1 + $0x368] sm:$0xf] }
  0x72   : > { %2997 = vmatpush1.bf16.msra.mxu0 %v2996_v5  ;;  %1007 = vmatprep.mubr.f32.mxu0 %v3252_v7 }
  0x73   : > { %2999 = vmatprep.subr.bf16.mxu0 %v2998_v6 }
  0x76   : > { %3001 = vmatpush1.bf16.msra.mxu0 %v3000_v11 }
  0x77   : > { %3003 = vmatprep.subr.bf16.mxu0 %v3002_v24 }
  0x7a   : > { %3005 = vmatpush1.bf16.msra.mxu0 %v3004_v13  ;;  %v1259_v13 = vld [vmem:[%s4176_s3] sm:$0xff] }
  0x7b   : > { %2533 = vmatprep.subr.msk.mxu0 %vm452_vm1, %v2532_v52  ;;  %v1260_v52 = vld [vmem:[%s4176_s3 + $0x8] sm:$0xff] }
  0x7c   : > { %v3027_v17 = vpack.c.bf16 %v1260_v52, %v1259_v13  ;;  %v2582_v13 = vld [vmem:[%s4176_s3 + $0x140] sm:$0xff]  ;;  %v2583_v52 = vld [vmem:[%s4176_s3 + $0x148] sm:$0xff] }
  0x7e   : > { %2534 = vmatpush1.msk.msra.mxu0 %vm452_vm1, %v2531_v14 }
  0x7f   : > { %2535 = vmatmul.mubr.msk.f32.vlgmr.msra.gmra.mrb[0].mxu0 %vm445_vm3, %v3447_v39  ;;  %3080 = vmatprep.subr.bf16.mxu0 %v3254_v58 }
  0x80   : > { %1013 = vmatprep.mubr.f32.mxu0 %v3252_v7 }
  0x83   : > { %2536 = vmatmul.mubr.msk.f32.gmra.mrb[2].mxu0 %vm445_vm3, %v3477_v53 }
  0x84   : > { %1019 = vmatprep.mubr.f32.mxu0 %v3252_v7 }
  0x87   : > { %2537 = vmatmul.mubr.msk.f32.gmra.mrb[4].mxu0 %vm445_vm3, %v3491_v59  ;;  %v1262_v59 = vld [vmem:[%s4176_s3 + $0x18] sm:$0xff] }
  0x88   : > { %2867 = vmatprep.mubr.msk.f32.mxu0 %vm3255_vm11, %v3252_v7 }
 0x152   : > { %v1009_v16 = vpop.f32.mrb[0].mxu0 }
 0x153   : > { %v1011_v18 = vpop.f32.mrb[1].mxu0 }
 0x154   : > { %v3178_v19 = vpack.i.bf16 %v1011_v18, %v1009_v16 }
 0x156   : > { %3179 = vrot.lane.b32.xlu0 %v3178_v19, %s3253_s13  ;;  %v1015_v39 = vpop.f32.mrb[2].mxu0 }
 0x157   : > { %v1017_v23 = vpop.f32.mrb[3].mxu0 }
 0x158   : > { %v3183_v53 = vpack.i.bf16 %v1017_v23, %v1015_v39 }
 0x15a   : > { %3184 = vrot.lane.b32.xlu0 %v3183_v53, %s3253_s13  ;;  %v1021_v28 = vpop.f32.mrb[4].mxu0  ;;  %v1261_v53 = vld [vmem:[%s4176_s3 + $0x10] sm:$0xff] }
 0x15b   : > { %1046 = vrot.lane.b32.xlu1 %v1021_v28, %s3253_s13  ;;  %v1023_v41 = vpop.f32.mrb[5].mxu0 }
 0x15f   : > { %1048 = vrot.lane.b32.xlu1 %v1023_v41, %s3253_s13  ;;  %s377_s13 = sand.u32 1, %s3242_s18  }
 0x160   : > { %s378_s16 = scalar_lea.vmem [#allocation2], %s377_s13 }
 0x161   : > { %s2364_s22 = sshll.u32 %s378_s16, 4  ;;  %s4133_s22 = int_to_ptr.vmem [resolvable:$true] %s2364_s22 }
 0x162   : > { %s3188_s24 = scalar_lea.vmem %s4133_s22, 16  ;;  %p3195_p0 = scmp.lt.s32.totalorder %s4133_s22, %s3193_s12 }
 0x163   : > { %p3189_p11 = scmp.ne.s32.totalorder %s4133_s22, %s3188_s24  ;;  %p3196_p1 = scmp.lt.s32.totalorder %s3194_s14, %s3188_s24 }
 0x165   : > { %p3190_p12 = pnand %p3189_p11, %p3356_p5  ;;  %p3197_p2 = por %p3196_p1, %p3195_p0 }
 0x167   : > { %p3191_p13 = pneg %p3190_p12 }
 0x169   : > { %p3198_p3 = pnand %p3197_p2, %p3191_p13 }
 0x1c8   : > { %v3180_v30 = vpop.permute.xlu0 %3179 }
 0x1c9   : > { %v3182_v31 = vunpack.i.h.bf16 %v3180_v30  ;;  %v3181_v32 = vunpack.i.l.bf16 %v3180_v30  ;;  %v3030_v30 = vpack.c.bf16 %v1262_v59, %v1261_v53  ;;  %v1849_v59 = vld [vmem:[%s4178_s5 + $0x10] sm:$0xff] }
 0x1cb   : > { %v1051_v40 = vsel %vm1050_vm10, %v3181_v32, %v3182_v31  ;;  %v1263_v31 = vld [vmem:[%s4176_s3 + $0x20] sm:$0xff]  ;;  %v1264_v32 = vld [vmem:[%s4176_s3 + $0x28] sm:$0xff] }
 0x1cc   : > { %v3185_v33 = vpop.permute.xlu0 %3184  ;;  %v1057_v44 = vmax.f32 %v1009_v16, %v1051_v40  ;;  %v2558_v40 = vld [vmem:[%s4176_s3 + $0x90] sm:$0xff] }
 0x1cd   : > { %v3187_v34 = vunpack.i.h.bf16 %v3185_v33  ;;  %v3186_v35 = vunpack.i.l.bf16 %v3185_v33  ;;  %v1047_v38 = vpop.permute.xlu1 %1046  ;;  %v3033_v33 = vpack.c.bf16 %v1264_v32, %v1263_v31  ;;  %v1851_v31 = vld [vmem:[%s4178_s5 + $0x20] sm:$0xf]  ;;  %v2595_v32 = vld [vmem:[%s4178_s5 + $0x48] sm:$0xf] }
 0x1cf   : > { %v1052_v43 = vsel %vm1050_vm10, %v3186_v35, %v3187_v34  ;;  %v1265_v34 = vld [vmem:[%s4176_s3 + $0x30] sm:$0xff]  ;;  %v1266_v35 = vld [vmem:[%s4176_s3 + $0x38] sm:$0xff] }
 0x1d0   : > { %v1058_v45 = vmax.f32 %v1015_v39, %v1052_v43  ;;  %v2559_v43 = vld [vmem:[%s4176_s3 + $0x98] sm:$0xff] }
 0x1d1   : > { %v1049_v46 = vpop.permute.xlu1 %1048 }
 0x1d2   : > { %v1053_v47 = vsel %vm1050_vm10, %v1047_v38, %v1049_v46  ;;  %v3006_v48 = vpack.c.bf16 %v1058_v45, %v1057_v44  ;;  %v3036_v38 = vpack.c.bf16 %v1266_v35, %v1265_v34  ;;  %v1267_v44 = vld [vmem:[%s4176_s3 + $0x40] sm:$0xff]  ;;  %v3039_v45 = vpack.c.bf16 %v2559_v43, %v2558_v40 }
 0x1d3   : > { %v1059_v49 = vmax.f32 %v1021_v28, %v1053_v47  ;;  %v2560_v46 = vld [vmem:[%s4176_s3 + $0xa0] sm:$0xff]  ;;  %v2561_v47 = vld [vmem:[%s4176_s3 + $0xa8] sm:$0xff] }
 0x1d4   : > { %3007 = vmatprep.subr.bf16.mxu1 %v3006_v48 }
 0x1d5   : > { %3009 = vmatpush3.bf16.msra.mxu1 %v3006_v48 }
 0x1d6   : > { %2715 = vmatprep.subr.mxu1 %v1059_v49 }
 0x1d9   : > { %2716 = vmatpush3.msra.mxu1 %v1059_v49 }
 0x1da   : > { %2718 = vmatmul.mubr.msk.f32.vlgmr.msra.gmra.mrb[0].mxu1 %vm1081_vm6, %v2539_v50  ;;  %3011 = vmatprep.subr.bf16.mxu1 %v3006_v48  ;;  %v2563_v50 = vld [vmem:[%s4176_s3 + $0xb8] sm:$0xff] }
 0x1db   : > { %3013 = vmatpush3.bf16.msra.mxu1 %v3006_v48  ;;  %2726 = vmatprep.mubr.msk.f32.mxu1 %vm1081_vm6, %v3812_v51  ;;  %v3042_v48 = vpack.c.bf16 %v2561_v47, %v2560_v46 }
 0x1dc   : > { %2724 = vmatprep.subr.mxu1 %v1059_v49 }
 0x1df   : > { %2725 = vmatpush3.msra.mxu1 %v1059_v49  ;;  %v2562_v49 = vld [vmem:[%s4176_s3 + $0xb0] sm:$0xff] }
 0x1e0   : > { %2727 = vmatmul.mubr.msk.f32.vlgmr.msra.gmra.mrb[2].mxu1 %vm1081_vm6, %v2541_v54  ;;  %3014 = vmatprep.subr.bf16.mxu1 %v3254_v58  ;;  %v3045_v54 = vpack.c.bf16 %v2563_v50, %v2562_v49  ;;  %v2023_v49 = vld [vmem:[%s4180_s7 + $0x8] sm:$0xff] }
 0x1e1   : > { %3016 = vmatpush3.bf16.msra.mxu1 %v3015_v57  ;;  %2747 = vmatprep.mubr.msk.f32.mxu1 %vm3255_vm11, %v3252_v7  ;;  %v3048_v57 = vpack.c.bf16 %v2565_v56, %v2564_v55  ;;  %v2604_v55 = vld [vmem:[%s4180_s7 + $0x20] sm:$0xff] }
 0x1e2   : > { %3017 = vmatprep.subr.bf16.mxu1 %v3254_v58 }
 0x1e5   : > { %3019 = vmatpush3.bf16.msra.mxu1 %v3018_v62  ;;  %v2566_v62 = vld [vmem:[%s4176_s3 + $0xd0] sm:$0xff] }
 0x1e6   : > { %3020 = vmatprep.subr.bf16.mxu1 %v3254_v58 }
 0x1e9   : > { %3022 = vmatpush3.bf16.msra.mxu1 %v3021_v1  ;;  %v2571_v1 = vld [vmem:[%s4176_s3 + $0xf0] sm:$0xff] }
 0x1ea   : > { %3023 = vmatprep.subr.bf16.mxu1 %v3254_v58  ;;  %v3054_v2 = vpack.c.bf16 %v2571_v1, %v2570_v0  ;;  %v2600_v0 = vld [vmem:[%s4179_s6] ss:$0 sm:$0xff] }
 0x1ed   : > { %3025 = vmatpush3.bf16.msra.mxu1 %v3024_v4  ;;  %v2573_v4 = vld [vmem:[%s4176_s3 + $0x100] sm:$0xff] }
 0x1ee   : > { %2745 = vmatprep.subr.mxu1 %v3252_v7 }
 0x1f1   : > { %2746 = vmatpush3.msra.mxu1 %v2555_v37  ;;  %v3057_v37 = vpack.c.bf16 %v2573_v4, %v2572_v3 }
 0x1f2   : > { %3026 = vmatprep.subr.bf16.mxu1 %v3254_v58 }
 0x2ad   : > { %v2719_v5 = vpop.f32.mrb[0].mxu1 }
 0x2ae   : > { %v1154_v6 = vpop.f32.mrb[1].mxu1 }
 0x2b3   : > { %v2728_v8 = vpop.f32.mrb[2].mxu1 }
 0x2b4   : > { %v1245_v10 = vmax.f32 %v2719_v5, %v2728_v8  ;;  %v1235_v42 = vpop.f32.mrb[3].mxu1  ;;  %v2574_v5 = vld [vmem:[%s4176_s3 + $0x108] sm:$0xff] }
 0x2b5   : > { %v1244_v11 = vmax.f32 %v1154_v6, %v1235_v42  ;;  %v2575_v6 = vld [vmem:[%s4176_s3 + $0x110] sm:$0xff]  ;;  %v2576_v42 = vld [vmem:[%s4176_s3 + $0x118] sm:$0xff] }
 0x2b6   : > { %v1254_v24 = vadd.f32 %v2546_v9, %v1245_v10  ;;  %v3060_v8 = vpack.c.bf16 %v2575_v6, %v2574_v5  ;;  %v2579_v10 = vld [vmem:[%s4176_s3 + $0x128] sm:$0xff]  ;;  %v2609_v5 = vld [vmem:[%s4180_s7 + $0x38] sm:$0xff] }
 0x2b7   : > { %v1253_v27 = vadd.f32 %v2546_v9, %v1244_v11  ;;  %v2578_v9 = vld [vmem:[%s4176_s3 + $0x120] sm:$0xff] }
 0x2b8   : > { %v1256_v12 = vmul.f32 0.01, %v1254_v24  ;;  %v3063_v11 = vpack.c.bf16 %v2579_v10, %v2578_v9  ;;  %v2610_v9 = vld [vmem:[%s4180_s7 + $0x40] sm:$0x3] }
 0x2b9   : > { %v1255_v14 = vmul.f32 0.01, %v1253_v27 }
 0x2ba   : > { %v1258_v15 = vmax.f32 %v1254_v24, %v1256_v12  ;;  %v2580_v24 = vld [vmem:[%s4176_s3 + $0x130] sm:$0xff] }
 0x2bb   : > { %v1257_v16 = vmax.f32 %v1253_v27, %v1255_v14  ;;  %v2581_v27 = vld [vmem:[%s4176_s3 + $0x138] sm:$0xff]  ;;  %v3069_v14 = vpack.c.bf16 %v2583_v52, %v2582_v13  ;;  %v2021_v52 = vld [vmem:[%s4181_s8] sm:$0x1] }
 0x2bc   : > { %v1281_v18 = vrot.slane %v1258_v15, 1  ;;  %v1439_v19 = vrot.slane %v1258_v15, 2  ;;  %v1525_v20 = vrot.slane %v1258_v15, 3  ;;  %v1611_v36 = vrot.slane %v1258_v15, 4  ;;  %v2584_v15 = vld [vmem:[%s4176_s3 + $0x150] sm:$0xff] }
 0x2bd   : > { %v1280_v21 = vrot.slane %v1257_v16, 1  ;;  %v1438_v39 = vrot.slane %v1257_v16, 2  ;;  %v1524_v22 = vrot.slane %v1257_v16, 3  ;;  %v1610_v23 = vrot.slane %v1257_v16, 4 }
 0x2be   : > { %v3066_v12 = vpack.c.bf16 %v2581_v27, %v2580_v24  ;;  %v2270_v27 = vld [vmem:[%s4182_s9 + $0x10] sm:$0xf] }
 0x2bf   : > { %v1282_v26 = vsel %vm437_vm2, %v1280_v21, %v1281_v18  ;;  %v1440_v28 = vsel %vm660_vm4, %v1438_v39, %v1439_v19  ;;  %v3876_v29 = vsel %vm792_vm0, %v1524_v22, %v1525_v20  ;;  %v3879_v41 = vsel %vm452_vm1, %v1610_v23, %v1611_v36  ;;  %v2586_v18 = vld [vmem:[%s4176_s3 + $0x160] sm:$0xff]  ;;  %v2591_v23 = vld [vmem:[%s4178_s5 + $0x28] sm:$0xff] }
 0x2c0   : > { %2748 = vmatmul.mubr.msk.f32.vlgmr.msra.gmra.mrb[4].mxu1 %vm1283_vm12, %v1282_v26  ;;  %v1847_v39 = vld [vmem:[%s4178_s5] sm:$0xff]  ;;  %v1850_v26 = vld [vmem:[%s4178_s5 + $0x18] sm:$0xff]  ;;  %vm2025_vm0 = vcmask 146432   ;;  %vm2272_vm2 = vcmask 162816  }
 0x2c1   : > { %3028 = vmatpush3.bf16.msra.mxu1 %v3027_v17  ;;  %2768 = vmatprep.mubr.msk.f32.mxu1 %vm3255_vm11, %v3252_v7 }
 0x2c2   : > { %3029 = vmatprep.subr.bf16.mxu1 %v3254_v58 }
 0x2c5   : > { %3031 = vmatpush3.bf16.msra.mxu1 %v3030_v30 }
 0x2c6   : > { %3032 = vmatprep.subr.bf16.mxu1 %v3254_v58 }
 0x2c9   : > { %3034 = vmatpush3.bf16.msra.mxu1 %v3033_v33 }
 0x2ca   : > { %3035 = vmatprep.subr.bf16.mxu1 %v3254_v58 }
 0x2cd   : > { %3037 = vmatpush3.bf16.msra.mxu1 %v3036_v38  ;;  %v2590_v38 = vld [vmem:[%s4177_s4] ss:$0 sm:$0xff] }
 0x2ce   : > { %2766 = vmatprep.subr.mxu1 %v3252_v7 }
 0x2d1   : > { %2767 = vmatpush3.msra.mxu1 %v1267_v44 }
 0x2d2   : > { %2769 = vmatmul.mubr.msk.f32.vlgmr.msra.gmra.mrb[4].mxu1 %vm1283_vm12, %v1257_v16  ;;  %3038 = vmatprep.subr.bf16.mxu1 %v3254_v58  ;;  %v2585_v16 = vld [vmem:[%s4176_s3 + $0x158] sm:$0xff] }
 0x2d3   : > { %3040 = vmatpush3.bf16.msra.mxu1 %v3039_v45  ;;  %2789 = vmatprep.mubr.msk.f32.mxu1 %vm3255_vm11, %v3252_v7  ;;  %v3072_v17 = vpack.c.bf16 %v2585_v16, %v2584_v15 }
 0x2d4   : > { %3041 = vmatprep.subr.bf16.mxu1 %v3254_v58 }
 0x2d7   : > { %3043 = vmatpush3.bf16.msra.mxu1 %v3042_v48  ;;  %v2022_v48 = vld [vmem:[%s4180_s7] sm:$0xff] }
 0x2d8   : > { %3044 = vmatprep.subr.bf16.mxu1 %v3254_v58  ;;  %v3087_v50 = vpack.c.bf16 %v2023_v49, %v2022_v48 }
 0x2db   : > { %3046 = vmatpush3.bf16.msra.mxu1 %v3045_v54  ;;  %v2603_v54 = vld [vmem:[%s4180_s7 + $0x18] sm:$0xff] }
 0x2dc   : > { %3047 = vmatprep.subr.bf16.mxu1 %v3254_v58  ;;  %v3090_v56 = vpack.c.bf16 %v2604_v55, %v2603_v54 }
 0x2df   : > { %3049 = vmatpush3.bf16.msra.mxu1 %v3048_v57  ;;  %v2024_v57 = vld [vmem:[%s4180_s7 + $0x10] sm:$0x3] }
 0x2e0   : > { %2787 = vmatprep.subr.mxu1 %v3252_v7 }
 0x2e3   : > { %2788 = vmatpush3.msra.mxu1 %v2566_v62 }
 0x2e4   : > { %2790 = vmatmul.mubr.msk.f32.vlgmr.msra.gmra.mrb[4].mxu1 %vm1283_vm12, %v1440_v28  ;;  %3050 = vmatprep.subr.bf16.mxu1 %v3254_v58  ;;  %v3084_v28 = vpack.c.bf16 %v1850_v26, %v1849_v59 }
 0x2e5   : > { %3052 = vmatpush3.bf16.msra.mxu1 %v3051_v63  ;;  %2810 = vmatprep.mubr.msk.f32.mxu1 %vm3255_vm11, %v3252_v7 }
 0x2e6   : > { %3053 = vmatprep.subr.bf16.mxu1 %v3254_v58 }
 0x2e9   : > { %3055 = vmatpush3.bf16.msra.mxu1 %v3054_v2 }
 0x2ea   : > { %3056 = vmatprep.subr.bf16.mxu1 %v3254_v58 }
 0x2ed   : > { %3058 = vmatpush3.bf16.msra.mxu1 %v3057_v37  ;;  %v2608_v37 = vld [vmem:[%s4180_s7 + $0x30] sm:$0xff] }
 0x2ee   : > { %3059 = vmatprep.subr.bf16.mxu1 %v3254_v58  ;;  %v3093_v6 = vpack.c.bf16 %v2609_v5, %v2608_v37 }
 0x2f1   : > { %3061 = vmatpush3.bf16.msra.mxu1 %v3060_v8 }
 0x2f2   : > { %2808 = vmatprep.subr.mxu1 %v3252_v7 }
 0x2f5   : > { %2809 = vmatpush3.msra.mxu1 %v2576_v42  ;;  %v2268_v42 = vld [vmem:[%s4182_s9] sm:$0xff] }
 0x2f6   : > { %2811 = vmatmul.mubr.msk.f32.vlgmr.msra.gmra.mrb[4].mxu1 %vm1283_vm12, %v3876_v29  ;;  %3062 = vmatprep.subr.bf16.mxu1 %v3254_v58  ;;  %v2593_v29 = vld [vmem:[%s4178_s5 + $0x38] sm:$0xff] }
 0x2f7   : > { %3064 = vmatpush3.bf16.msra.mxu1 %v3063_v11  ;;  %2831 = vmatprep.mubr.msk.f32.mxu1 %vm3255_vm11, %v3252_v7  ;;  %v2269_v11 = vld [vmem:[%s4182_s9 + $0x8] sm:$0xff] }
 0x2f8   : > { %3065 = vmatprep.subr.bf16.mxu1 %v3254_v58  ;;  %v3096_v24 = vpack.c.bf16 %v2269_v11, %v2268_v42 }
 0x2fb   : > { %3067 = vmatpush3.bf16.msra.mxu1 %v3066_v12 }
 0x2fc   : > { %3068 = vmatprep.subr.bf16.mxu1 %v3254_v58 }
 0x2ff   : > { %3070 = vmatpush3.bf16.msra.mxu1 %v3069_v14 }
 0x300   : > { %3071 = vmatprep.subr.bf16.mxu1 %v3254_v58 }
 0x303   : > { %3073 = vmatpush3.bf16.msra.mxu1 %v3072_v17 }
 0x304   : > { %2829 = vmatprep.subr.mxu1 %v3252_v7 }
 0x307   : > { %2830 = vmatpush3.msra.mxu1 %v2586_v18 }
 0x308   : > { %2832 = vmatmul.mubr.msk.f32.vlgmr.msra.gmra.mrb[4].mxu1 %vm1283_vm12, %v3879_v41  ;;  %2834 = vmatprep.subr.mxu1 %v3252_v7  ;;  %v2594_v41 = vld [vmem:[%s4178_s5 + $0x40] sm:$0xff] }
 0x309   : > { %2836 = vmatprep.mubr.msk.f32.mxu1 %vm3255_vm11, %v3252_v7  ;;  %v3078_v30 = vpack.c.bf16 %v2594_v41, %v2593_v29 }
 0x3db   : > { %v1681_v19 = vpop.f32.mrb[4].mxu1 }
 0x3dc   : > { %1687 = vrot.lane.b32.xlu0 %v1681_v19, %s3256_s29  ;;  %v2833_v20 = vpop.f32.mrb[5].mxu1  ;;  %s2352_s29 = scalar_lea.sflag [#allocation3], %s377_s13 }
 0x44e   : > { %v1688_v36 = vpop.permute.xlu0 %1687 }
 0x44f   : > { %v1690_v21 = vmax.f32 %v1681_v19, %v1688_v36  ;;  %v2271_v19 = vld [vmem:[%s4183_s10] sm:$0x1] }
 0x451   : > { %2835 = vmatpush3.msra.mxu1 %v1690_v21 }
 0x452   : > { %2837 = vmatmul.mubr.msk.f32.vlgmr.msra.gmra.mrb[6].mxu1 %vm1691_vm13, %v3799_v25  ;;  %2839 = vmatprep.subr.mxu1 %v3252_v7  ;;  %v1848_v25 = vld [vmem:[%s4178_s5 + $0x8] sm:$0xff] }
 0x453   : > { %2840 = vmatpush3.msra.mxu1 %v1690_v21  ;;  %2841 = vmatprep.mubr.msk.f32.mxu1 %vm3255_vm11, %v3252_v7  ;;  %v3081_v22 = vpack.c.bf16 %v1848_v25, %v1847_v39 }
 0x454   : > { %3074 = vmatprep.subr.bf16.mxu1 %v3254_v58 }
 0x455   : > { %3082 = vmatpush3.bf16.msra.mxu0 %v3081_v22 }
 0x456   : > { %2842 = vmatmul.mubr.msk.f32.vlgmr.msra.gmra.mrb[8].mxu1 %vm1691_vm13, %v3812_v51  ;;  %v2592_v51 = vld [vmem:[%s4178_s5 + $0x30] sm:$0xff]  ;;  %3083 = vmatprep.subr.bf16.mxu0 %v3254_v58 }
 0x457   : > { %2854 = vmatprep.mubr.msk.f32.mxu1 %vm3255_vm11, %v3252_v7  ;;  %v3075_v53 = vpack.c.bf16 %v2592_v51, %v2591_v23 }
 0x459   : > { %3076 = vmatpush3.bf16.msra.mxu1 %v3075_v53  ;;  %3085 = vmatpush3.bf16.msra.mxu0 %v3084_v28 }
 0x45a   : > { %3077 = vmatprep.subr.bf16.mxu1 %v3254_v58  ;;  %2865 = vmatprep.subr.mxu0 %v3252_v7 }
 0x45d   : > { %3079 = vmatpush3.bf16.msra.mxu1 %v3078_v30  ;;  %2866 = vmatpush3.msk.msra.mxu0 %vm452_vm1, %v1851_v31 }
 0x45e   : > { %2852 = vmatprep.subr.mxu1 %v3252_v7  ;;  %3086 = vmatprep.subr.bf16.mxu0 %v3254_v58 }
 0x461   : > { %2853 = vmatpush3.msk.msra.mxu1 %vm452_vm1, %v2595_v32 }
 0x462   : > { %3089 = vmatprep.subr.bf16.mxu1 %v3254_v58 }
 0x525   : > { %v1760_v33 = vpop.f32.mrb[6].mxu1 }
 0x526   : > { %v2838_v34 = vpop.f32.mrb[7].mxu1 }
 0x529   : > { %v1832_v35 = vpop.f32.mrb[8].mxu1 }
 0x52a   : > { %v1836_v40 = vmax.f32 %v1760_v33, %v1832_v35  ;;  %v2843_v43 = vpop.f32.mrb[9].mxu1 }
 0x52c   : > { %v1844_v44 = vadd.f32 %v2590_v38, %v1836_v40 }
 0x52e   : > { %v1845_v45 = vmul.f32 0.01, %v1844_v44 }
 0x530   : > { %v1846_v46 = vmax.f32 %v1844_v44, %v1845_v45 }
 0x532   : > { %v1859_v47 = vrot.slane %v1846_v46, 1  ;;  %2868 = vmatmul.mubr.msk.f32.vlgmr.msra.gmra.mrb[6].mxu0 %vm1860_vm14, %v1846_v46 }
 0x533   : > { %2876 = vmatprep.mubr.msk.f32.mxu0 %vm3255_vm11, %v3252_v7  ;;  %3088 = vmatpush3.bf16.msra.mxu0 %v3087_v50 }
 0x534   : > { %2855 = vmatmul.mubr.msk.f32.vlgmr.msra.gmra.mrb[10].mxu1 %vm1860_vm14, %v1859_v47  ;;  %2874 = vmatprep.subr.mxu0 %v3252_v7 }
 0x535   : > { %2885 = vmatprep.mubr.msk.f32.mxu1 %vm3255_vm11, %v3252_v7  ;;  %3091 = vmatpush3.bf16.msra.mxu1 %v3090_v56 }
 0x536   : > { %2883 = vmatprep.subr.mxu1 %v3252_v7 }
 0x537   : > { %2875 = vmatpush3.msk.msra.mxu0 %vm2029_vm15, %v2024_v57 }
 0x538   : > { %3095 = vmatprep.subr.bf16.mxu0 %v3254_v58 }
 0x539   : > { %2884 = vmatpush3.msk.msra.mxu1 %vm2029_vm15, %v2605_v60 }
 0x53a   : > { %3092 = vmatprep.subr.bf16.mxu1 %v3254_v58 }
 0x605   : > { %v2007_v61 = vpop.f32.mrb[6].mxu0 }
 0x606   : > { %v2869_v62 = vpop.f32.mrb[7].mxu0 }
 0x607   : > { %v1932_v63 = vpop.f32.mrb[10].mxu1 }
 0x608   : > { %v2008_v1 = vadd.f32 %v2007_v61, %v1932_v63  ;;  %v2856_v2 = vpop.f32.mrb[11].mxu1 }
 0x60a   : > { %v2018_v3 = vadd.f32 %v2600_v0, %v2008_v1 }
 0x60c   : > { %v2019_v4 = vmul.f32 0.01, %v2018_v3 }
 0x60e   : > { %v2020_v58 = vmax.f32 %v2018_v3, %v2019_v4 }
 0x610   : > { %v2108_v8 = vrot.slane %v2020_v58, 1  ;;  %2877 = vmatmul.mubr.msk.f32.vlgmr.msra.gmra.mrb[8].mxu0 %vm2025_vm0, %v2020_v58  ;;  %v2189_v10 = vrot.slane %v2020_v58, 2 }
 0x611   : > { %2903 = vmatprep.mubr.msk.f32.mxu0 %vm3255_vm11, %v3252_v7  ;;  %3097 = vmatpush3.bf16.msra.mxu0 %v3096_v24 }
 0x612   : > { %2886 = vmatmul.mubr.msk.f32.vlgmr.msra.gmra.mrb[12].mxu1 %vm2025_vm0, %v2108_v8  ;;  %2901 = vmatprep.subr.mxu0 %v3252_v7 }
 0x613   : > { %3094 = vmatpush3.bf16.msra.mxu1 %v3093_v6  ;;  %2894 = vmatprep.mubr.msk.f32.mxu1 %vm3255_vm11, %v3252_v7 }
 0x614   : > { %2892 = vmatprep.subr.mxu1 %v3252_v7 }
 0x615   : > { %2902 = vmatpush3.msk.msra.mxu0 %vm452_vm1, %v2270_v27  ;;  %vm2349_vm1 = vcmask 73728  }
 0x617   : > { %2893 = vmatpush3.msk.msra.mxu1 %vm2029_vm15, %v2610_v9 }
 0x61a   : > { %2895 = vmatmul.mubr.msk.f32.vlgmr.msra.gmra.mrb[12].mxu1 %vm2025_vm0, %v2189_v10 }
 0x6e3   : > { %v2099_v12 = vpop.f32.mrb[8].mxu0 }
 0x6e4   : > { %v2878_v13 = vpop.f32.mrb[9].mxu0  ;;  %v2103_v14 = vadd.f32 %v2099_v12, %v2021_v52 }
 0x6ed   : > { %v2261_v15 = vpop.f32.mrb[12].mxu1 }
 0x6ee   : > { %v3099_v16 = vadd.f32 %v2261_v15, %v2103_v14  ;;  %v2896_v17 = vpop.f32.mrb[13].mxu1 }
 0x6f0   : > { %v2266_v18 = vmul.f32 0.01, %v3099_v16 }
 0x6f2   : > { %v2267_v7 = vmax.f32 %v3099_v16, %v2266_v18 }
 0x6f4   : > { %2904 = vmatmul.mubr.msk.f32.vlgmr.msra.gmra.mrb[10].mxu0 %vm2272_vm2, %v2267_v7 }
 0x7c7   : > { %v2345_v20 = vpop.f32.mrb[10].mxu0 }
 0x7c8   : > { %v2346_v36 = vadd.f32 %v2345_v20, %v2271_v19  ;;  %v2905_v21 = vpop.f32.mrb[11].mxu0 }
 0x7ca   : > { %2350 = vst.msk [vmem:[%s378_s16] sm:$0x1] %vm2349_vm1, %v2346_v36 }
 0x7cb   : > { %3201 = shalt.err (!%p3198_p3)
}
 0x7cc   : > { %s3202_s13 = scalar_lea.hbm %s4131_s25, 16  ;;  %s3206_s16 = scalar_lea.hbm %s4184_s11, 32 }
 0x7cd   : > { %p3203_p4 = scmp.ne.s32.totalorder %s4131_s25, %s3202_s13  ;;  %p3207_p9 = scmp.lt.u32.totalorder %s4131_s25, %s4184_s11 }
 0x7ce   : > { %p3208_p10 = scmp.lt.u32.totalorder %s3206_s16, %s3202_s13  ;;  %p3210_p12 = scmp.lt.u32.totalorder %s3202_s13, %s4131_s25 }
 0x7cf   : > { %p3204_p7 = pnand %p3203_p4, %p3356_p5 }
 0x7d0   : > { %p3209_p11 = por %p3208_p10, %p3207_p9 }
 0x7d1   : > { %p3205_p8 = pneg %p3204_p7 }
 0x7d2   : > { %p3211_p13 = por %p3210_p12, %p3209_p11 }
 0x7d4   : > { %p3212_p0 = pnand %p3211_p13, %p3205_p8 }
 0x7d6   : > { %3215 = shalt.err (!%p3212_p0)
}
 0x7d7   : > { %3134 = dma.vmem_to_hbm [thread:$0]  (%p3356_p5), %s4133_s22, 16, %s4131_s25, %s2352_s29  }
 0x7d8 PF: > { %p3140_p1 = scmp.ge.s32.totalorder %s3250_s20, 2  ;;  %s2376_s24 = sand.u32 1, %s3238_s17  }
 0x7d9   : > { %s2377_s21 = scalar_lea.sflag [#allocation3], %s2376_s24 }
 0x7da   : > { %p3137_p2 = pnand %p3140_p1, %p3360_p6 }
 0x7dc   : > { %3233 = dma.done.wait (!%p3137_p2), %s2377_s21, 16  }
 0x7dd   : > { %3235 = vsyncadd (!%p3137_p2), %s2377_s21, 4294967280  ;;  %s4192_s12 = sld [smem:[#allocation5_spill]]  ;;  %s4193_s19 = sld [smem:[#allocation6_spill]] }
 0x7de   : > { %p21_p3 = scmp.ge.s32.totalorder %s3343_s23, 4   ;;  %s4194_s17 = smov %s3242_s18 }
 0x7df   : > { %s4196_s20 = smov %s3343_s23 }
 0x7e0   :  { %23 = sbr.rel (!%p21_p3) target bundleno = 3 (0x3), region = 110 }
 0x7e3   : > { %s4195_s18 = smov %s4192_s12 }
 0x7e7   :  { %2381 = vsyncpa [#allocation3], 1 }
 0x7e8   :  { %2383 = vsyncpa [#allocation3 + $0x1], 1 }

</bundles_post_ra>
